<compile_context>
chip_gen: v7x
topology: tpu7x:2x2x1
jax: 0.10.0
libtpu: 0.0.40
codegen_flags: <defaults>
</compile_context>

<pallas_src>
import functools

import jax
import jax.numpy as jnp
from jax.experimental import pallas as pl
from jax.experimental.pallas import tpu as pltpu


def _geb_kernel(vf_ref, s_ref, wv_ref, w1v_ref, w1s_ref, b1_ref, w2_ref, b2_ref,
                ov_ref, os_ref, *, v_out, s_out, epsilon):
    # --- vector_net: one fused GEMM against the block-diagonal packed weight.
    # Columns of vm: [vo0 | vo1 | vs0 | vs1], each block v_out wide.
    vm = jnp.dot(vf_ref[...], wv_ref[...], preferred_element_type=jnp.float32)
    vo0 = vm[:, 0 * v_out:1 * v_out]
    vo1 = vm[:, 1 * v_out:2 * v_out]
    vs0 = vm[:, 2 * v_out:3 * v_out]
    vs1 = vm[:, 3 * v_out:4 * v_out]

    # torch.norm over the size-2 equivariant axis, + epsilon (f32 throughout).
    v_norm = jnp.sqrt(vs0 * vs0 + vs1 * vs1) + epsilon            # [tn, v_out]

    # --- scalar_net layer 1 as two dots (no in-kernel lane concat of [v_norm|s]).
    pre = (jnp.dot(v_norm.astype(w1v_ref.dtype), w1v_ref[...],
                   preferred_element_type=jnp.float32)
           + jnp.dot(s_ref[...], w1s_ref[...],
                     preferred_element_type=jnp.float32)
           + b1_ref[...])                                         # f32 bias
    h = pre * jax.nn.sigmoid(pre)                                 # SiLU in f32
    mix = jnp.dot(h.astype(w2_ref.dtype), w2_ref[...],
                  preferred_element_type=jnp.float32) + b2_ref[...]
    s_o = mix[:, :s_out]                                          # [tn, s_out]
    gate = mix[:, s_out:]                                         # [tn, v_out]

    # Gated vector output, packed [gated_v0 | gated_v1]; scalar output separate.
    ov_ref[...] = jnp.concatenate([vo0 * gate, vo1 * gate],
                                  axis=-1).astype(ov_ref.dtype)
    os_ref[...] = s_o.astype(os_ref.dtype)


def pack_params(params, dtype=jnp.bfloat16):
    """One-time packing of torch-layout weights into kernel-ready operands.

    Weights are packed/cast once (bf16 by default); biases stay f32.  No
    Python-int metadata is stored: everything the wrapper needs is recovered
    from static array shapes, which keeps the wrapper safe under jax.jit.
    """
    f32 = jnp.float32
    Wv = jnp.asarray(params["Wv"], f32)      # [2*v_out, v_in]
    W1 = jnp.asarray(params["W1"], f32)      # [h_dim, v_out + s_in]
    b1 = jnp.asarray(params["b1"], f32)      # [h_dim]
    W2 = jnp.asarray(params["W2"], f32)      # [s_out + v_out, h_dim]
    b2 = jnp.asarray(params["b2"], f32)      # [s_out + v_out]

    v_out = Wv.shape[0] // 2
    v_in = Wv.shape[1]
    h_dim = W1.shape[0]

    WvT = Wv.T                               # [v_in, 2*v_out]
    Wv_o, Wv_s = WvT[:, :v_out], WvT[:, v_out:]
    Z = jnp.zeros((v_in, v_out), f32)
    # Block-diagonal packing: one GEMM on [n, 2*v_in] yields [vo0|vo1|vs0|vs1].
    Wv_big = jnp.concatenate([
        jnp.concatenate([Wv_o, Z,    Wv_s, Z], axis=1),
        jnp.concatenate([Z,    Wv_o, Z,    Wv_s], axis=1),
    ], axis=0)                               # [2*v_in, 4*v_out]

    W1T = W1.T                               # [v_out + s_in, h_dim]
    return {
        "Wv_big": Wv_big.astype(dtype),
        "W1T_v": W1T[:v_out].astype(dtype),          # [v_out, h_dim]
        "W1T_s": W1T[v_out:].astype(dtype),          # [s_in, h_dim]
        "b1": b1.reshape(1, h_dim),                  # f32
        "W2T": W2.T.astype(dtype),                   # [h_dim, s_out + v_out]
        "b2": b2.reshape(1, W2.shape[0]),            # f32
    }


def gated_equivariant_block(v, s, packed, *, epsilon=1e-8, tile_n=1024):
    """v: [N, 2, v_in], s: [N, s_in] -> (v_out [N, 2, v_out], s_out [N, s_out])."""
    N, two, v_in = v.shape
    assert two == 2
    s_in = s.shape[-1]

    Wv_big, W1T_v, W1T_s = packed["Wv_big"], packed["W1T_v"], packed["W1T_s"]
    b1, W2T, b2 = packed["b1"], packed["W2T"], packed["b2"]

    # All static dims come from array shapes (concrete even under jit).
    v_out_dim = Wv_big.shape[1] // 4
    h_dim = W1T_v.shape[1]
    s_out_dim = W2T.shape[1] - v_out_dim
    cdtype = Wv_big.dtype

    def _round_up(a, m):
        return ((a + m - 1) // m) * m

    # Node tile: multiple of 16 (bf16 sublane packing), at most tile_n, and
    # capped so the grid keeps >= 2 steps (shards across v7x's 2 TensorCores).
    tile = min(_round_up(tile_n, 16), _round_up(max(pl.cdiv(N, 2), 16), 16))
    grid = (pl.cdiv(N, tile),)

    # Free view [N, 2, v_in] -> [N, 2*v_in]; cast activations to the compute
    # dtype (ideally the upstream producer already emits bf16 so this fuses).
    vf = v.reshape(N, 2 * v_in).astype(cdtype)
    sf = s.astype(cdtype)

    def row_spec(feat):
        # TODO(synk): add pipeline_mode=pl.Buffered(3) here if xprof shows
        # exposed input DMA after the tile-size increase.
        return pl.BlockSpec((tile, feat), lambda i: (i, 0))

    def full_spec(r, c):
        return pl.BlockSpec((r, c), lambda i: (0, 0))

    in_specs = [
        row_spec(2 * v_in),                          # vf
        row_spec(s_in),                              # s
        full_spec(2 * v_in, 4 * v_out_dim),          # Wv_big
        full_spec(v_out_dim, h_dim),                 # W1T_v
        full_spec(s_in, h_dim),                      # W1T_s
        full_spec(1, h_dim),                         # b1
        full_spec(h_dim, s_out_dim + v_out_dim),     # W2T
        full_spec(1, s_out_dim + v_out_dim),         # b2
    ]
    out_specs = (
        pl.BlockSpec((tile, 2 * v_out_dim), lambda i: (i, 0)),
        pl.BlockSpec((tile, s_out_dim), lambda i: (i, 0)),
    )
    out_shape = (
        jax.ShapeDtypeStruct((N, 2 * v_out_dim), jnp.float32),
        jax.ShapeDtypeStruct((N, s_out_dim), jnp.float32),
    )

    out_v, out_s = pl.pallas_call(
        functools.partial(_geb_kernel, v_out=v_out_dim, s_out=s_out_dim,
                          epsilon=epsilon),
        out_shape=out_shape,
        grid=grid,
        in_specs=in_specs,
        out_specs=out_specs,
        compiler_params=pltpu.CompilerParams(
            dimension_semantics=("parallel",),
            vmem_limit_bytes=32 * 1024 * 1024,
        ),
    )(vf, sf, Wv_big, W1T_v, W1T_s, b1, W2T, b2)

    # [N, 2*v_out] -> [N, 2, v_out] is a free contiguous view; no slicing.
    return out_v.reshape(N, 2, v_out_dim), out_s


def _reference(v, s, params, epsilon=1e-8):
    """Pure-JAX f32 reference mirroring the PyTorch forward exactly."""
    Wv, W1, b1, W2, b2 = (params[k] for k in ("Wv", "W1", "b1", "W2", "b2"))
    v_out_dim = Wv.shape[0] // 2
    s_out_dim = W2.shape[0] - v_out_dim
    v_mix = v @ Wv.T                                        # [N, 2, 2*v_out]
    v_o, v_s = v_mix[..., :v_out_dim], v_mix[..., v_out_dim:]
    v_norm = jnp.linalg.norm(v_s, axis=-2) + epsilon        # [N, v_out]
    s_stack = jnp.concatenate([v_norm, s], axis=-1)
    pre = s_stack @ W1.T + b1
    h = pre * jax.nn.sigmoid(pre)
    mix = h @ W2.T + b2
    s_out, v_gate = mix[..., :s_out_dim], mix[..., s_out_dim:]
    return v_o * v_gate[:, None, :], s_out


if __name__ == "__main__":
    # Small, module-consistent shapes. N is intentionally not a multiple of the
    # tile (exercises the ragged last block) and the tile cap yields 2 grid
    # steps so the "parallel" axis can shard across v7x's two TensorCores.
    N, v_in, s_in, v_out, s_out, h_dim = 500, 16, 8, 16, 8, 32

    key = jax.random.PRNGKey(0)
    kv, ks, k1, k2, k3, k4, k5 = jax.random.split(key, 7)

    v = jax.random.normal(kv, (N, 2, v_in), dtype=jnp.float32)
    s = jax.random.normal(ks, (N, s_in), dtype=jnp.float32)

    # Deterministic parameter init (torch nn.Linear weight layout: [out, in]).
    params = {
        "Wv": jax.random.normal(k1, (2 * v_out, v_in), dtype=jnp.float32) * 0.1,
        "W1": jax.random.normal(k2, (h_dim, v_out + s_in), dtype=jnp.float32) * 0.1,
        "b1": jax.random.normal(k3, (h_dim,), dtype=jnp.float32) * 0.1,
        "W2": jax.random.normal(k4, (v_out + s_out, h_dim), dtype=jnp.float32) * 0.1,
        "b2": jax.random.normal(k5, (v_out + s_out,), dtype=jnp.float32) * 0.1,
    }

    # One-time weight packing (hoisted out of the per-call path), bf16 operands.
    packed = pack_params(params, dtype=jnp.bfloat16)

    fwd = jax.jit(functools.partial(gated_equivariant_block,
                                    epsilon=1e-8, tile_n=1024))
    v_res, s_res = fwd(v, s, packed)
    jax.block_until_ready((v_res, s_res))

    v_ref, s_ref = _reference(v, s, params)
    assert v_res.shape == (N, 2, v_out) and s_res.shape == (N, s_out)
    # bf16 operands (f32 accumulation) -> loosened tolerance vs. the f32 reference.
    assert jnp.allclose(v_res, v_ref, atol=5e-2, rtol=5e-2)
    assert jnp.allclose(s_res, s_ref, atol=5e-2, rtol=5e-2)

    print("KERNEL_OK")
</pallas_src>

<mosaic_0001>
module attributes {stable_mosaic.version = 11 : i64} {
  func.func @_geb_kernel(%arg0: i32, %arg1: memref<256x32xbf16, #tpu.memory_space<vmem>>, %arg2: memref<256x8xbf16, #tpu.memory_space<vmem>>, %arg3: memref<32x64xbf16, #tpu.memory_space<vmem>>, %arg4: memref<16x32xbf16, #tpu.memory_space<vmem>>, %arg5: memref<8x32xbf16, #tpu.memory_space<vmem>>, %arg6: memref<1x32xf32, #tpu.memory_space<vmem>>, %arg7: memref<32x24xbf16, #tpu.memory_space<vmem>>, %arg8: memref<1x24xf32, #tpu.memory_space<vmem>>, %arg9: memref<256x32xf32, #tpu.memory_space<vmem>>, %arg10: memref<256x8xf32, #tpu.memory_space<vmem>>) attributes {dimension_semantics = [#tpu.dimension_semantics<parallel>], iteration_bounds = array<i64: 2>, scalar_prefetch = 0 : i64, scratch_operands = 0 : i64, tpu.core_type = #tpu.core_type<tc>, window_params = [{transform_indices = @transform_0, window_bounds = array<i64: 256, 32>}, {transform_indices = @transform_1, window_bounds = array<i64: 256, 8>}, {pipeline_mode = #tpu.pipeline_mode<synchronous>, transform_indices = @transform_2, window_bounds = array<i64: 32, 64>}, {pipeline_mode = #tpu.pipeline_mode<synchronous>, transform_indices = @transform_3, window_bounds = array<i64: 16, 32>}, {pipeline_mode = #tpu.pipeline_mode<synchronous>, transform_indices = @transform_4, window_bounds = array<i64: 8, 32>}, {pipeline_mode = #tpu.pipeline_mode<synchronous>, transform_indices = @transform_5, window_bounds = array<i64: 1, 32>}, {pipeline_mode = #tpu.pipeline_mode<synchronous>, transform_indices = @transform_6, window_bounds = array<i64: 32, 24>}, {pipeline_mode = #tpu.pipeline_mode<synchronous>, transform_indices = @transform_7, window_bounds = array<i64: 1, 24>}, {transform_indices = @transform_8, window_bounds = array<i64: 256, 32>}, {transform_indices = @transform_9, window_bounds = array<i64: 256, 8>}]} {
    %c0 = arith.constant 0 : index
    %c0_0 = arith.constant 0 : index
    %0 = vector.load %arg1[%c0, %c0_0] : memref<256x32xbf16, #tpu.memory_space<vmem>>, vector<256x32xbf16>
    %c0_1 = arith.constant 0 : index
    %c0_2 = arith.constant 0 : index
    %1 = vector.load %arg3[%c0_1, %c0_2] : memref<32x64xbf16, #tpu.memory_space<vmem>>, vector<32x64xbf16>
    %cst = arith.constant dense<0.000000e+00> : vector<256x64xf32>
    %2 = tpu.matmul %0, %1, %cst {dimension_numbers = #tpu.dot_dimension_numbers<[1], [0], [0], [1], [0, 0, 1, 1], [], []>} : vector<256x32xbf16>, vector<32x64xbf16>, vector<256x64xf32> -> vector<256x64xf32>
    %3 = vector.extract_strided_slice %2 {offsets = [0, 0], sizes = [256, 16], strides = [1, 1]} : vector<256x64xf32> to vector<256x16xf32>
    %4 = vector.extract_strided_slice %2 {offsets = [0, 16], sizes = [256, 16], strides = [1, 1]} : vector<256x64xf32> to vector<256x16xf32>
    %5 = vector.extract_strided_slice %2 {offsets = [0, 32], sizes = [256, 16], strides = [1, 1]} : vector<256x64xf32> to vector<256x16xf32>
    %6 = vector.extract_strided_slice %2 {offsets = [0, 48], sizes = [256, 16], strides = [1, 1]} : vector<256x64xf32> to vector<256x16xf32>
    %7 = arith.mulf %5, %5 : vector<256x16xf32>
    %8 = arith.mulf %6, %6 : vector<256x16xf32>
    %9 = arith.addf %7, %8 : vector<256x16xf32>
    %10 = math.sqrt %9 : vector<256x16xf32>
    %cst_3 = arith.constant 9.99999993E-9 : f32
    %11 = vector.broadcast %cst_3 : f32 to vector<256x16xf32>
    %12 = arith.addf %10, %11 : vector<256x16xf32>
    %13 = arith.truncf %12 : vector<256x16xf32> to vector<256x16xbf16>
    %c0_4 = arith.constant 0 : index
    %c0_5 = arith.constant 0 : index
    %14 = vector.load %arg4[%c0_4, %c0_5] : memref<16x32xbf16, #tpu.memory_space<vmem>>, vector<16x32xbf16>
    %cst_6 = arith.constant dense<0.000000e+00> : vector<256x32xf32>
    %15 = tpu.matmul %13, %14, %cst_6 {dimension_numbers = #tpu.dot_dimension_numbers<[1], [0], [0], [1], [0, 0, 1, 1], [], []>} : vector<256x16xbf16>, vector<16x32xbf16>, vector<256x32xf32> -> vector<256x32xf32>
    %c0_7 = arith.constant 0 : index
    %c0_8 = arith.constant 0 : index
    %16 = vector.load %arg2[%c0_7, %c0_8] : memref<256x8xbf16, #tpu.memory_space<vmem>>, vector<256x8xbf16>
    %c0_9 = arith.constant 0 : index
    %c0_10 = arith.constant 0 : index
    %17 = vector.load %arg5[%c0_9, %c0_10] : memref<8x32xbf16, #tpu.memory_space<vmem>>, vector<8x32xbf16>
    %cst_11 = arith.constant dense<0.000000e+00> : vector<256x32xf32>
    %18 = tpu.matmul %16, %17, %cst_11 {dimension_numbers = #tpu.dot_dimension_numbers<[1], [0], [0], [1], [0, 0, 1, 1], [], []>} : vector<256x8xbf16>, vector<8x32xbf16>, vector<256x32xf32> -> vector<256x32xf32>
    %19 = arith.addf %15, %18 : vector<256x32xf32>
    %c0_12 = arith.constant 0 : index
    %c0_13 = arith.constant 0 : index
    %20 = vector.load %arg6[%c0_12, %c0_13] : memref<1x32xf32, #tpu.memory_space<vmem>>, vector<1x32xf32>
    %21 = vector.broadcast %20 : vector<1x32xf32> to vector<256x32xf32>
    %22 = arith.addf %19, %21 : vector<256x32xf32>
    %23 = arith.negf %22 : vector<256x32xf32>
    %24 = math.exp %23 : vector<256x32xf32>
    %cst_14 = arith.constant 1.000000e+00 : f32
    %25 = vector.broadcast %cst_14 : f32 to vector<256x32xf32>
    %26 = arith.addf %25, %24 : vector<256x32xf32>
    %27 = arith.divf %25, %26 : vector<256x32xf32>
    %28 = arith.mulf %22, %27 : vector<256x32xf32>
    %29 = arith.truncf %28 : vector<256x32xf32> to vector<256x32xbf16>
    %c0_15 = arith.constant 0 : index
    %c0_16 = arith.constant 0 : index
    %30 = vector.load %arg7[%c0_15, %c0_16] : memref<32x24xbf16, #tpu.memory_space<vmem>>, vector<32x24xbf16>
    %cst_17 = arith.constant dense<0.000000e+00> : vector<256x24xf32>
    %31 = tpu.matmul %29, %30, %cst_17 {dimension_numbers = #tpu.dot_dimension_numbers<[1], [0], [0], [1], [0, 0, 1, 1], [], []>} : vector<256x32xbf16>, vector<32x24xbf16>, vector<256x24xf32> -> vector<256x24xf32>
    %c0_18 = arith.constant 0 : index
    %c0_19 = arith.constant 0 : index
    %32 = vector.load %arg8[%c0_18, %c0_19] : memref<1x24xf32, #tpu.memory_space<vmem>>, vector<1x24xf32>
    %33 = vector.broadcast %32 : vector<1x24xf32> to vector<256x24xf32>
    %34 = arith.addf %31, %33 : vector<256x24xf32>
    %35 = vector.extract_strided_slice %34 {offsets = [0, 0], sizes = [256, 8], strides = [1, 1]} : vector<256x24xf32> to vector<256x8xf32>
    %36 = vector.extract_strided_slice %34 {offsets = [0, 8], sizes = [256, 16], strides = [1, 1]} : vector<256x24xf32> to vector<256x16xf32>
    %37 = arith.mulf %3, %36 : vector<256x16xf32>
    %38 = arith.mulf %4, %36 : vector<256x16xf32>
    %39 = tpu.concatenate %37, %38 in 1 : vector<256x16xf32>, vector<256x16xf32> -> vector<256x32xf32>
    %c0_20 = arith.constant 0 : index
    %c0_21 = arith.constant 0 : index
    %40 = vector.load %arg9[%c0_20, %c0_21] : memref<256x32xf32, #tpu.memory_space<vmem>>, vector<256x32xf32>
    tpu.vector_store %arg9[%c0_20, %c0_21], %39 {strides = array<i32>} : memref<256x32xf32, #tpu.memory_space<vmem>>, vector<256x32xf32>,
    %c0_22 = arith.constant 0 : index
    %c0_23 = arith.constant 0 : index
    %41 = vector.load %arg10[%c0_22, %c0_23] : memref<256x8xf32, #tpu.memory_space<vmem>>, vector<256x8xf32>
    tpu.vector_store %arg10[%c0_22, %c0_23], %35 {strides = array<i32>} : memref<256x8xf32, #tpu.memory_space<vmem>>, vector<256x8xf32>,
    return
  }
  func.func @transform_0(%arg0: i32) -> (i32, i32) {
    %c0_i32 = arith.constant 0 : i32
    %c0_i32_0 = arith.constant 0 : i32
    return %arg0, %c0_i32 : i32, i32
  }
  func.func @transform_1(%arg0: i32) -> (i32, i32) {
    %c0_i32 = arith.constant 0 : i32
    %c0_i32_0 = arith.constant 0 : i32
    return %arg0, %c0_i32 : i32, i32
  }
  func.func @transform_2(%arg0: i32) -> (i32, i32) {
    %c0_i32 = arith.constant 0 : i32
    %c0_i32_0 = arith.constant 0 : i32
    %c0_i32_1 = arith.constant 0 : i32
    return %c0_i32, %c0_i32_0 : i32, i32
  }
  func.func @transform_3(%arg0: i32) -> (i32, i32) {
    %c0_i32 = arith.constant 0 : i32
    %c0_i32_0 = arith.constant 0 : i32
    %c0_i32_1 = arith.constant 0 : i32
    return %c0_i32, %c0_i32_0 : i32, i32
  }
  func.func @transform_4(%arg0: i32) -> (i32, i32) {
    %c0_i32 = arith.constant 0 : i32
    %c0_i32_0 = arith.constant 0 : i32
    %c0_i32_1 = arith.constant 0 : i32
    return %c0_i32, %c0_i32_0 : i32, i32
  }
  func.func @transform_5(%arg0: i32) -> (i32, i32) {
    %c0_i32 = arith.constant 0 : i32
    %c0_i32_0 = arith.constant 0 : i32
    %c0_i32_1 = arith.constant 0 : i32
    return %c0_i32, %c0_i32_0 : i32, i32
  }
  func.func @transform_6(%arg0: i32) -> (i32, i32) {
    %c0_i32 = arith.constant 0 : i32
    %c0_i32_0 = arith.constant 0 : i32
    %c0_i32_1 = arith.constant 0 : i32
    return %c0_i32, %c0_i32_0 : i32, i32
  }
  func.func @transform_7(%arg0: i32) -> (i32, i32) {
    %c0_i32 = arith.constant 0 : i32
    %c0_i32_0 = arith.constant 0 : i32
    %c0_i32_1 = arith.constant 0 : i32
    return %c0_i32, %c0_i32_0 : i32, i32
  }
  func.func @transform_8(%arg0: i32) -> (i32, i32) {
    %c0_i32 = arith.constant 0 : i32
    %c0_i32_0 = arith.constant 0 : i32
    return %arg0, %c0_i32 : i32, i32
  }
  func.func @transform_9(%arg0: i32) -> (i32, i32) {
    %c0_i32 = arith.constant 0 : i32
    %c0_i32_0 = arith.constant 0 : i32
    return %arg0, %c0_i32 : i32, i32
  }
}

</mosaic_0001>

<bundles_post_ra>
// kernel: gated_equivariant_block.1
= control target key start
LH: loop header
LB: loop body
LE: loop exit
PB: predicated region body
PF: predicated region fallthrough
CT: control target
= control target key end

     0   :  { %s5911_s0 = inlined_call_operand.vmem [shape: bf16[500,32], index: 0, kind: input, shape index: {}]   ;;  %s5912_s1 = inlined_call_operand.vmem [shape: bf16[500,8], index: 1, kind: input, shape index: {}]   ;;  %s5913_s2 = inlined_call_operand.vmem [shape: bf16[32,64], index: 2, kind: input, shape index: {}]   ;;  %s5914_s3 = inlined_call_operand.vmem [shape: bf16[16,32], index: 3, kind: input, shape index: {}]   ;;  %s5915_s4 = inlined_call_operand.vmem [shape: bf16[8,32], index: 4, kind: input, shape index: {}]   ;;  %s5916_s5 = inlined_call_operand.vmem [shape: f32[1,32], index: 5, kind: input, shape index: {}]   ;;  %s5917_s6 = inlined_call_operand.vmem [shape: bf16[32,24], index: 6, kind: input, shape index: {}]   ;;  %s5918_s7 = inlined_call_operand.vmem [shape: f32[1,24], index: 7, kind: input, shape index: {}]   ;;  %s5919_s8 = inlined_call_operand.vmem [shape: f32[500,32], index: 8, kind: output, shape index: {0}]   ;;  %s5920_s9 = inlined_call_operand.vmem [shape: f32[500,8], index: 9, kind: output, shape index: {1}]  }
   0x1   :  { %5955 = sst [smem:[#allocation21_spill]] %s5911_s0 }
   0x2   :  { %5956 = sst [smem:[#allocation22_spill]] %s5912_s1 }
   0x3   :  { %s4383_s30 = smov 0   ;;  %s4385_s10 = smov 0  }
   0x4   :  { %s4387_s11 = smov 0  }
   0x5 LB: > { %s4396_s12 = sadd.s32 4294967295, %s4263_s11   ;;  %s4398_s13 = sadd.s32 1, %s4263_s11   ;;  %s4263_s11 = sphi %s4387_s11, %s6006_s11   ;;  %s4259_s10 = sphi %s4385_s10, %s6005_s10   ;;  %s4255_s30 = sphi %s4383_s30, %s6004_s30  }
   0x6   : > { %s202_s14 = ssub.s32 %s4263_s11, %s4398_s13  ;;  %s205_s15 = sadd.s32 1, %s4259_s10 }
   0x7   : > { %p203_p0 = scmp.eq.s32.totalorder %s202_s14, 0  ;;  %p215_p1 = scmp.ne.s32.totalorder %s4259_s10, %s4255_s30 }
   0x8   : > { %p216_p2 = scmp.eq.s32.totalorder %s4396_s12, 1  ;;  %p3369_p3 = scmp.ge.s32.totalorder %s4263_s11, 1 }
   0x9   : > { %s4406_s16 = scalar_select %p203_p0, %s4259_s10, %s205_s15  }
   0xa   : > { %p4408_p4 = por %p216_p2, %p215_p1  ;;  %p318_p5 = scmp.lt.s32.totalorder %s4263_s11, 3 }
   0xc   : > { %p319_p6 = pnand %p3369_p3, %p318_p5 }
   0xe   : > { %322 = sbr.rel (%p319_p6) target bundleno = 1327 (0x52f), region = 52 }
  0x15   : > { %v3948_v0 = vld [vmem:[%s5913_s2] sm:$0xff]   ;;  %s4416_s20 = sshll.u32 %s4396_s12, 5  ;;  %v3949_v1 = vld [vmem:[%s5913_s2 + $0x8] sm:$0xff]   ;;  %s5958_s0 = sld [smem:[#allocation21_spill]]  ;;  %vm537_vm0 = vcmask 261120   ;;  %vm1375_vm1 = vcmask 1043456  }
  0x16   : > { %p375_p7 = scmp.lt.s32.totalorder %s4416_s20, 62  ;;  %3619 = vmatprep.subr.bf16.mxu0 %v3948_v0  ;;  %s4329_s28 = smov 112   ;;  %vm1326_vm2 = vcmask 64512  }
  0x17   : > { %3620 = vmatpush3.bf16.msra.mxu0 %v3948_v0  ;;  %s5976_s1 = sld [smem:[#allocation22_spill]]  ;;  %s4330_s22 = smov 96  }
  0x18   : > { %s4423_s23 = scalar_select %p375_p7, %s4416_s20, 62  ;;  %3621 = vmatprep.subr.bf16.mxu0 %v3949_v1 }
  0x19   : > { %s361_s29 = sand.u32 1, %s4255_s30   ;;  %s4331_s30 = smov 120  }
  0x1a   : > { %s3373_s24 = sshll.u32 %s4423_s23, 2  ;;  %s5310_s11 = sshll.u32 %s361_s29, 8 }
  0x1b   : > { %s4431_s27 = scalar_lea.vmem %s5958_s0, %s3373_s24  ;;  %3622 = vmatpush3.bf16.msra.mxu0 %v3949_v1  ;;  %s4332_s19 = smov 8  }
  0x1c   : > { %v3950_v2 = vld [vmem:[%s4431_s27] sm:$0xff]   ;;  %v3951_v3 = vld [vmem:[%s4431_s27 + $0x8] sm:$0xff]   ;;  %v3952_v4 = vld [vmem:[%s4431_s27 + $0x10] sm:$0xff]   ;;  %s5483_s21 = scalar_lea.vmem [#allocation2], %s5310_s11   ;;  %s3543_s23 = sshll.u32 (%p4408_p4), %s4396_s12, 8 }
  0x1d   : > { %3623 = vmatprep.mubr.msk.bf16.mxu0 %vm537_vm0, %v3950_v2  ;;  %v3953_v5 = vld [vmem:[%s4431_s27 + $0x18] sm:$0xff]   ;;  %v3954_v6 = vld [vmem:[%s4431_s27 + $0x20] sm:$0xff]   ;;  %v3955_v7 = vld [vmem:[%s4431_s27 + $0x28] sm:$0xff]   ;;  %s4729_s18 = scalar_lea.vmem %s5976_s1, %s3373_s24  ;;  %s5650_s26 = scalar_lea.vmem (%p4408_p4), %s5919_s8, %s3543_s23  }
  0x1e   : > { %3624 = vmatmul.mubr.msk.bf16.vlgmr.msra.gmra.mrb[0].mxu0 %vm537_vm0, %v3951_v3  ;;  %v3956_v8 = vld [vmem:[%s4431_s27 + $0x30] sm:$0xff]   ;;  %v3957_v9 = vld [vmem:[%s4431_s27 + $0x38] sm:$0xff]   ;;  %v3958_v10 = vld [vmem:[%s4431_s27 + $0x40] sm:$0xff]  }
  0x1f   : > { %3627 = vmatprep.mubr.msk.bf16.mxu0 %vm537_vm0, %v3952_v4  ;;  %v3959_v11 = vld [vmem:[%s4431_s27 + $0x48] sm:$0xff]   ;;  %v3960_v12 = vld [vmem:[%s4431_s27 + $0x50] sm:$0xff]   ;;  %v3961_v13 = vld [vmem:[%s4431_s27 + $0x58] sm:$0xff]  }
  0x20   : > { %v3962_v14 = vld [vmem:[%s4431_s27 + $0x60] sm:$0xff]   ;;  %v3963_v15 = vld [vmem:[%s4431_s27 + $0x68] sm:$0xff]   ;;  %v3964_v16 = vld [vmem:[%s4431_s27 + $0x70] sm:$0xff]  }
  0x21   : > { %v3965_v17 = vld [vmem:[%s4431_s27 + $0x78] sm:$0xff]  }
  0x26   : > { %3628 = vmatmul.mubr.msk.bf16.gmra.mrb[4].mxu0 %vm537_vm0, %v3953_v5 }
  0x27   : > { %3631 = vmatprep.mubr.msk.bf16.mxu0 %vm537_vm0, %v3954_v6 }
  0x2e   : > { %3632 = vmatmul.mubr.msk.bf16.gmra.mrb[8].mxu0 %vm537_vm0, %v3955_v7 }
  0x2f   : > { %3635 = vmatprep.mubr.msk.bf16.mxu0 %vm537_vm0, %v3956_v8 }
  0x36   : > { %3636 = vmatmul.mubr.msk.bf16.gmra.mrb[12].mxu0 %vm537_vm0, %v3957_v9 }
  0x37   : > { %3639 = vmatprep.mubr.msk.bf16.mxu0 %vm537_vm0, %v3958_v10 }
  0x3e   : > { %3640 = vmatmul.mubr.msk.bf16.gmra.mrb[16].mxu0 %vm537_vm0, %v3959_v11 }
  0x3f   : > { %3643 = vmatprep.mubr.msk.bf16.mxu0 %vm537_vm0, %v3960_v12 }
  0x46   : > { %3644 = vmatmul.mubr.msk.bf16.gmra.mrb[20].mxu0 %vm537_vm0, %v3961_v13 }
  0x47   : > { %3647 = vmatprep.mubr.msk.bf16.mxu0 %vm537_vm0, %v3962_v14 }
  0x4e   : > { %3648 = vmatmul.mubr.msk.bf16.gmra.mrb[24].mxu0 %vm537_vm0, %v3963_v15 }
  0x4f   : > { %3651 = vmatprep.mubr.msk.bf16.mxu0 %vm537_vm0, %v3964_v16 }
  0x56   : > { %3652 = vmatmul.mubr.msk.bf16.gmra.mrb[28].mxu0 %vm537_vm0, %v3965_v17 }
  0xf1   : > { %v4465_v18 = vpop.f32.mrb[0].mxu0 }
  0xf2   : > { %v4467_v19 = vpop.f32.mrb[1].mxu0  ;;  %v4471_v20 = vmul.f32 %v4465_v18, %v4465_v18 }
  0xf3   : > { %v4473_v21 = vpop.f32.mrb[2].mxu0  ;;  %v4477_v22 = vmul.f32 %v4467_v19, %v4467_v19 }
  0xf4   : > { %815 = vrot.lane.b32.xlu1 %v4471_v20, %s4329_s28  ;;  %v4481_v23 = vpop.f32.mrb[3].mxu0  ;;  %v4487_v24 = vmul.f32 %v4473_v21, %v4473_v21 }
  0xf5   : > { %811 = vrot.lane.b32.xlu0 %v4477_v22, %s4329_s28  ;;  %v4491_v25 = vmul.f32 %v4481_v23, %v4481_v23 }
  0xf8   : > { %817 = vrot.lane.b32.xlu1 %v4487_v24, %s4329_s28 }
  0xf9   : > { %813 = vrot.lane.b32.xlu0 %v4491_v25, %s4329_s28  ;;  %v4497_v26 = vpop.f32.mrb[4].mxu0 }
  0xfa   : > { %v4499_v27 = vpop.f32.mrb[5].mxu0  ;;  %v4511_v31 = vmul.f32 %v4497_v26, %v4497_v26 }
  0xfb   : > { %v4503_v28 = vmul.f32 %v4499_v27, %v4499_v27  ;;  %v4505_v29 = vpop.f32.mrb[6].mxu0 }
  0xfc   : > { %v4507_v30 = vpop.f32.mrb[7].mxu0  ;;  %v4521_v33 = vmul.f32 %v4505_v29, %v4505_v29 }
  0xfd   : > { %v4515_v32 = vmul.f32 %v4507_v30, %v4507_v30  ;;  %819 = vrot.lane.b32.xlu0 %v4503_v28, %s4329_s28 }
  0xff   : > { %821 = vrot.lane.b32.xlu1 %v4515_v32, %s4329_s28 }
 0x101   : > { %823 = vrot.lane.b32.xlu0 %v4511_v31, %s4329_s28  ;;  %v4527_v34 = vpop.f32.mrb[8].mxu0 }
 0x102   : > { %v4529_v35 = vpop.f32.mrb[9].mxu0  ;;  %v4543_v39 = vmul.f32 %v4527_v34, %v4527_v34 }
 0x103   : > { %v4533_v36 = vmul.f32 %v4529_v35, %v4529_v35  ;;  %825 = vrot.lane.b32.xlu1 %v4521_v33, %s4329_s28  ;;  %v4537_v37 = vpop.f32.mrb[10].mxu0 }
 0x104   : > { %v4539_v38 = vpop.f32.mrb[11].mxu0  ;;  %v4553_v41 = vmul.f32 %v4537_v37, %v4537_v37 }
 0x105   : > { %v4547_v40 = vmul.f32 %v4539_v38, %v4539_v38  ;;  %827 = vrot.lane.b32.xlu0 %v4533_v36, %s4329_s28 }
 0x107   : > { %829 = vrot.lane.b32.xlu1 %v4547_v40, %s4329_s28 }
 0x109   : > { %831 = vrot.lane.b32.xlu0 %v4543_v39, %s4329_s28  ;;  %v4559_v42 = vpop.f32.mrb[12].mxu0 }
 0x10a   : > { %v4561_v43 = vpop.f32.mrb[13].mxu0  ;;  %v4575_v47 = vmul.f32 %v4559_v42, %v4559_v42 }
 0x10b   : > { %v4565_v44 = vmul.f32 %v4561_v43, %v4561_v43  ;;  %833 = vrot.lane.b32.xlu1 %v4553_v41, %s4329_s28  ;;  %v4569_v45 = vpop.f32.mrb[14].mxu0 }
 0x10c   : > { %v4571_v46 = vpop.f32.mrb[15].mxu0  ;;  %v4585_v49 = vmul.f32 %v4569_v45, %v4569_v45 }
 0x10d   : > { %5959 = vst [vmem:[#allocation4_spill] sm:$0xff] %v4571_v46  ;;  %v4579_v48 = vmul.f32 %v4571_v46, %v4571_v46  ;;  %835 = vrot.lane.b32.xlu0 %v4565_v44, %s4329_s28 }
 0x10f   : > { %837 = vrot.lane.b32.xlu1 %v4579_v48, %s4329_s28 }
 0x111   : > { %839 = vrot.lane.b32.xlu0 %v4575_v47, %s4329_s28  ;;  %v4591_v50 = vpop.f32.mrb[16].mxu0 }
 0x112   : > { %5960 = vst [vmem:[#allocation5_spill] sm:$0xff] %v4591_v50  ;;  %v4593_v51 = vpop.f32.mrb[17].mxu0  ;;  %v4607_v55 = vmul.f32 %v4591_v50, %v4591_v50 }
 0x113   : > { %5961 = vst [vmem:[#allocation6_spill] sm:$0xff] %v4593_v51  ;;  %v4597_v52 = vmul.f32 %v4593_v51, %v4593_v51  ;;  %841 = vrot.lane.b32.xlu1 %v4585_v49, %s4329_s28  ;;  %v4601_v53 = vpop.f32.mrb[18].mxu0 }
 0x114   : > { %5962 = vst [vmem:[#allocation7_spill] sm:$0xff] %v4601_v53  ;;  %v4603_v54 = vpop.f32.mrb[19].mxu0  ;;  %v4617_v57 = vmul.f32 %v4601_v53, %v4601_v53 }
 0x115   : > { %5963 = vst [vmem:[#allocation8_spill] sm:$0xff] %v4603_v54  ;;  %v4611_v56 = vmul.f32 %v4603_v54, %v4603_v54  ;;  %843 = vrot.lane.b32.xlu0 %v4597_v52, %s4329_s28 }
 0x117   : > { %845 = vrot.lane.b32.xlu1 %v4611_v56, %s4329_s28 }
 0x119   : > { %847 = vrot.lane.b32.xlu0 %v4607_v55, %s4329_s28  ;;  %v4623_v58 = vpop.f32.mrb[20].mxu0 }
 0x11a   : > { %5964 = vst [vmem:[#allocation9_spill] sm:$0xff] %v4623_v58  ;;  %v4625_v59 = vpop.f32.mrb[21].mxu0  ;;  %v4639_v63 = vmul.f32 %v4623_v58, %v4623_v58 }
 0x11b   : > { %5965 = vst [vmem:[#allocation10_spill] sm:$0xff] %v4625_v59  ;;  %v4629_v60 = vmul.f32 %v4625_v59, %v4625_v59  ;;  %849 = vrot.lane.b32.xlu1 %v4617_v57, %s4329_s28  ;;  %v4633_v61 = vpop.f32.mrb[22].mxu0  ;;  %v3981_v59 = vld [vmem:[%s4729_s18 + $0x70] sm:$0xff]  }
 0x11c   : > { %5966 = vst [vmem:[#allocation11_spill] sm:$0xff] %v4633_v61  ;;  %v4635_v62 = vpop.f32.mrb[23].mxu0  ;;  %v4649_v1 = vmul.f32 %v4633_v61, %v4633_v61 }
 0x11d   : > { %5967 = vst [vmem:[#allocation12_spill] sm:$0xff] %v4635_v62  ;;  %v4643_v0 = vmul.f32 %v4635_v62, %v4635_v62  ;;  %851 = vrot.lane.b32.xlu0 %v4629_v60, %s4329_s28 }
 0x11f   : > { %853 = vrot.lane.b32.xlu1 %v4643_v0, %s4329_s28 }
 0x121   : > { %855 = vrot.lane.b32.xlu0 %v4639_v63, %s4329_s28  ;;  %v4655_v2 = vpop.f32.mrb[24].mxu0 }
 0x122   : > { %5968 = vst [vmem:[#allocation13_spill] sm:$0xff] %v4655_v2  ;;  %v4657_v3 = vpop.f32.mrb[25].mxu0  ;;  %v4671_v7 = vmul.f32 %v4655_v2, %v4655_v2  ;;  %v3973_v2 = vld [vmem:[%s4729_s18 + $0x30] sm:$0xff]  }
 0x123   : > { %5969 = vst [vmem:[#allocation14_spill] sm:$0xff] %v4657_v3  ;;  %v4661_v4 = vmul.f32 %v4657_v3, %v4657_v3  ;;  %857 = vrot.lane.b32.xlu1 %v4649_v1, %s4329_s28  ;;  %v4665_v5 = vpop.f32.mrb[26].mxu0  ;;  %v3971_v3 = vld [vmem:[%s4729_s18 + $0x20] sm:$0xff]  }
 0x124   : > { %5970 = vst [vmem:[#allocation15_spill] sm:$0xff] %v4665_v5  ;;  %v4667_v6 = vpop.f32.mrb[27].mxu0  ;;  %v4681_v9 = vmul.f32 %v4665_v5, %v4665_v5  ;;  %v3972_v5 = vld [vmem:[%s4729_s18 + $0x28] sm:$0xff]  }
 0x125   : > { %5971 = vst [vmem:[#allocation16_spill] sm:$0xff] %v4667_v6  ;;  %v4675_v8 = vmul.f32 %v4667_v6, %v4667_v6  ;;  %859 = vrot.lane.b32.xlu0 %v4661_v4, %s4329_s28  ;;  %v3970_v6 = vld [vmem:[%s4729_s18 + $0x18] sm:$0xff]  }
 0x127   : > { %861 = vrot.lane.b32.xlu1 %v4675_v8, %s4329_s28 }
 0x129   : > { %863 = vrot.lane.b32.xlu0 %v4671_v7, %s4329_s28  ;;  %v4687_v10 = vpop.f32.mrb[28].mxu0 }
 0x12a   : > { %5972 = vst [vmem:[#allocation17_spill] sm:$0xff] %v4687_v10  ;;  %v4689_v11 = vpop.f32.mrb[29].mxu0  ;;  %v4703_v15 = vmul.f32 %v4687_v10, %v4687_v10  ;;  %v1245_v10 = vld [vmem:[%s5915_s4] sm:$0xf] }
 0x12b   : > { %5973 = vst [vmem:[#allocation18_spill] sm:$0xff] %v4689_v11  ;;  %v4693_v12 = vmul.f32 %v4689_v11, %v4689_v11  ;;  %865 = vrot.lane.b32.xlu1 %v4681_v9, %s4329_s28  ;;  %v4697_v13 = vpop.f32.mrb[30].mxu0  ;;  %3791 = vmatprep.subr.msk.bf16.mxu1 %vm1375_vm1, %v1245_v10  ;;  %v3969_v11 = vld [vmem:[%s4729_s18 + $0x10] sm:$0xff]  }
 0x12c   : > { %5974 = vst [vmem:[#allocation19_spill] sm:$0xff] %v4697_v13  ;;  %v4699_v14 = vpop.f32.mrb[31].mxu0  ;;  %v4713_v17 = vmul.f32 %v4697_v13, %v4697_v13  ;;  %v3967_v13 = vld [vmem:[%s5914_s3] sm:$0xff]  }
 0x12d   : > { %5975 = vst [vmem:[#allocation20_spill] sm:$0xff] %v4699_v14  ;;  %v4707_v16 = vmul.f32 %v4699_v14, %v4699_v14  ;;  %867 = vrot.lane.b32.xlu0 %v4693_v12, %s4329_s28  ;;  %v1377_v14 = vsel %vm1375_vm1, %v1245_v10, 0  ;;  %v3966_v10 = vld [vmem:[%s4729_s18] sm:$0xff]  }
 0x12e   : > { %3656 = vmatpush3.bf16.msra.mxu1 %v1377_v14  ;;  %v3968_v14 = vld [vmem:[%s4729_s18 + $0x8] sm:$0xff]   ;;  %3657 = vmatprep.mubr.msk.bf16.mxu1 %vm1326_vm2, %v3966_v10  ;;  %v3975_v10 = vld [vmem:[%s4729_s18 + $0x40] sm:$0xff]  }
 0x12f   : > { %869 = vrot.lane.b32.xlu1 %v4707_v16, %s4329_s28  ;;  %3689 = vmatprep.subr.bf16.mxu1 %v3967_v13 }
 0x131   : > { %871 = vrot.lane.b32.xlu0 %v4703_v15, %s4329_s28  ;;  %3658 = vmatmul.mubr.msk.bf16.vlgmr.msra.gmra.mrb[0].mxu1 %vm1326_vm2, %v3968_v14  ;;  %v3977_v14 = vld [vmem:[%s4729_s18 + $0x50] sm:$0xff]  }
 0x132   : > { %3690 = vmatpush3.bf16.msra.mxu1 %v3967_v13  ;;  %3661 = vmatprep.mubr.msk.bf16.mxu1 %vm1326_vm2, %v3969_v11  ;;  %v3974_v13 = vld [vmem:[%s4729_s18 + $0x38] sm:$0xff]   ;;  %v3976_v11 = vld [vmem:[%s4729_s18 + $0x48] sm:$0xff]  }
 0x133   : > { %873 = vrot.lane.b32.xlu1 %v4713_v17, %s4329_s28 }
 0x139   : > { %3662 = vmatmul.mubr.msk.bf16.gmra.mrb[4].mxu1 %vm1326_vm2, %v3970_v6  ;;  %v3979_v6 = vld [vmem:[%s4729_s18 + $0x60] sm:$0xff]  }
 0x13a   : > { %3665 = vmatprep.mubr.msk.bf16.mxu1 %vm1326_vm2, %v3971_v3  ;;  %v3978_v3 = vld [vmem:[%s4729_s18 + $0x58] sm:$0xff]  }
 0x141   : > { %3666 = vmatmul.mubr.msk.bf16.gmra.mrb[8].mxu1 %vm1326_vm2, %v3972_v5 }
 0x142   : > { %3669 = vmatprep.mubr.msk.bf16.mxu1 %vm1326_vm2, %v3973_v2 }
 0x149   : > { %3670 = vmatmul.mubr.msk.bf16.gmra.mrb[12].mxu1 %vm1326_vm2, %v3974_v13  ;;  %v3980_v13 = vld [vmem:[%s4729_s18 + $0x68] sm:$0xff]  }
 0x14a   : > { %3673 = vmatprep.mubr.msk.bf16.mxu1 %vm1326_vm2, %v3975_v10 }
 0x151   : > { %3674 = vmatmul.mubr.msk.bf16.gmra.mrb[16].mxu1 %vm1326_vm2, %v3976_v11 }
 0x152   : > { %3677 = vmatprep.mubr.msk.bf16.mxu1 %vm1326_vm2, %v3977_v14 }
 0x159   : > { %3678 = vmatmul.mubr.msk.bf16.gmra.mrb[20].mxu1 %vm1326_vm2, %v3978_v3 }
 0x15a   : > { %3681 = vmatprep.mubr.msk.bf16.mxu1 %vm1326_vm2, %v3979_v6 }
 0x161   : > { %3682 = vmatmul.mubr.msk.bf16.gmra.mrb[24].mxu1 %vm1326_vm2, %v3980_v13 }
 0x162   : > { %3685 = vmatprep.mubr.msk.bf16.mxu1 %vm1326_vm2, %v3981_v59 }
 0x166   : > { %v816_v2 = vpop.permute.xlu1 %815 }
 0x167   : > { %v909_v5 = vadd.f32 %v816_v2, %v4471_v20  ;;  %v812_v62 = vpop.permute.xlu0 %811 }
 0x168   : > { %v4763_v10 = vadd.f32 %v812_v62, %v4477_v22  ;;  %v3982_v22 = vld [vmem:[%s4729_s18 + $0x78] sm:$0xff]   ;;  %s5320_s18 = scalar_lea.vmem [#allocation3], %s5310_s11  }
 0x169   : > { %3985 = vrsqrt.f32 %v909_v5  ;;  %vm955_vm3 = vcmp.eq.f32.partialorder %v909_v5, inf  ;;  %vm957_vm4 = vcmp.eq.f32.partialorder %v909_v5, 0.0  ;;  %3686 = vmatmul.mubr.msk.bf16.gmra.mrb[28].mxu1 %vm1326_vm2, %v3982_v22 }
 0x16a   : > { %3987 = vrsqrt.f32 %v4763_v10  ;;  %v818_v11 = vpop.permute.xlu1 %817  ;;  %vm941_vm6 = vcmp.eq.f32.partialorder %v4763_v10, inf  ;;  %vm943_vm7 = vcmp.eq.f32.partialorder %v4763_v10, 0.0  ;;  %v944_v59 = vand.u32 2147483648, %v4763_v10 }
 0x16b   : > { %v910_v14 = vadd.f32 %v818_v11, %v4487_v24  ;;  %v814_v61 = vpop.permute.xlu0 %813 }
 0x16c   : > { %v4770_v3 = vadd.f32 %v814_v61, %v4491_v25  ;;  %v958_v25 = vand.u32 2147483648, %v909_v5 }
 0x16d   : > { %3989 = vrsqrt.f32 %v910_v14  ;;  %vm962_vm5 = vcmp.eq.f32.partialorder %v910_v14, inf  ;;  %vm964_vm8 = vcmp.eq.f32.partialorder %v910_v14, 0.0 }
 0x16e   : > { %3991 = vrsqrt.f32 %v4770_v3  ;;  %vm948_vm9 = vcmp.eq.f32.partialorder %v4770_v3, inf  ;;  %vm950_vm10 = vcmp.eq.f32.partialorder %v4770_v3, 0.0 }
 0x16f   : > { %v820_v20 = vpop.permute.xlu0 %819 }
 0x170   : > { %v4776_v62 = vadd.f32 %v820_v20, %v4503_v28  ;;  %v965_v20 = vand.u32 2147483648, %v910_v14 }
 0x171   : > { %v822_v6 = vpop.permute.xlu1 %821 }
 0x172   : > { %3993 = vrsqrt.f32 %v4776_v62  ;;  %v4780_v24 = vadd.f32 %v822_v6, %v4515_v32  ;;  %vm969_vm11 = vcmp.eq.f32.partialorder %v4776_v62, inf  ;;  %vm971_vm12 = vcmp.eq.f32.partialorder %v4776_v62, 0.0 }
 0x173   : > { %v3986_v61 = vpop.eup %3985  ;;  %v824_v2 = vpop.permute.xlu0 %823 }
 0x174   : > { %v3988_v28 = vpop.eup %3987  ;;  %3995 = vrsqrt.f32 %v4780_v24  ;;  %v4788_v13 = vadd.f32 %v824_v2, %v4511_v31  ;;  %v954_v32 = vmul.f32 %v3986_v61, %v909_v5  ;;  %v951_v31 = vand.u32 2147483648, %v4770_v3 }
 0x175   : > { %v826_v11 = vpop.permute.xlu1 %825  ;;  %v940_v6 = vmul.f32 %v3988_v28, %v4763_v10  ;;  %v972_v28 = vand.u32 2147483648, %v4776_v62  ;;  %vm976_vm13 = vcmp.eq.f32.partialorder %v4780_v24, inf  ;;  %vm978_vm14 = vcmp.eq.f32.partialorder %v4780_v24, 0.0 }
 0x176   : > { %3997 = vrsqrt.f32 %v4788_v13  ;;  %v4795_v22 = vadd.f32 %v826_v11, %v4521_v33  ;;  %v956_v58 = vsel %vm955_vm3, %v909_v5, %v954_v32  ;;  %vm983_vm15 = vcmp.eq.f32.partialorder %v4788_v13, inf }
 0x177   : > { %v3990_v2 = vpop.eup %3989  ;;  %v828_v61 = vpop.permute.xlu0 %827  ;;  %v942_v54 = vsel %vm941_vm6, %v4763_v10, %v940_v6  ;;  %v959_v32 = vsel %vm957_vm4, %v958_v25, %v956_v58  ;;  %v979_v6 = vand.u32 2147483648, %v4780_v24  ;;  %vm985_vm1 = vcmp.eq.f32.partialorder %v4788_v13, 0.0 }
 0x178   : > { %v3992_v51 = vpop.eup %3991  ;;  %3999 = vrsqrt.f32 %v4795_v22  ;;  %v4807_v33 = vadd.f32 %v828_v61, %v4533_v36  ;;  %v961_v11 = vmul.f32 %v3990_v2, %v910_v14  ;;  %v945_v58 = vsel %vm943_vm7, %v944_v59, %v942_v54 }
 0x179   : > { %v830_v53 = vpop.permute.xlu1 %829  ;;  %v947_v50 = vmul.f32 %v3992_v51, %v4770_v3  ;;  %v1165_v25 = vadd.f32 1e-08, %v959_v32  ;;  %vm990_vm3 = vcmp.eq.f32.partialorder %v4795_v22, inf  ;;  %vm992_vm4 = vcmp.eq.f32.partialorder %v4795_v22, 0.0 }
 0x17a   : > { %4001 = vrsqrt.f32 %v4807_v33  ;;  %v4816_v46 = vadd.f32 %v830_v53, %v4547_v40  ;;  %v963_v36 = vsel %vm962_vm5, %v910_v14, %v961_v11  ;;  %v986_v40 = vand.u32 2147483648, %v4788_v13 }
 0x17b   : > { %v832_v5 = vpop.permute.xlu0 %831  ;;  %v966_v51 = vsel %vm964_vm8, %v965_v20, %v963_v36  ;;  %v949_v2 = vsel %vm948_vm9, %v4770_v3, %v947_v50  ;;  %v1163_v20 = vadd.f32 1e-08, %v945_v58  ;;  %v993_v32 = vand.u32 2147483648, %v4795_v22 }
 0x17c   : > { %v3994_v53 = vpop.eup %3993  ;;  %4003 = vrsqrt.f32 %v4816_v46  ;;  %v4830_v10 = vadd.f32 %v832_v5, %v4543_v39  ;;  %v1166_v54 = vadd.f32 1e-08, %v966_v51  ;;  %v952_v14 = vsel %vm950_vm10, %v951_v31, %v949_v2 }
 0x17d   : > { %v834_v59 = vpop.permute.xlu1 %833  ;;  %v1164_v61 = vadd.f32 1e-08, %v952_v14  ;;  %v968_v50 = vmul.f32 %v3994_v53, %v4776_v62  ;;  %vm997_vm5 = vcmp.eq.f32.partialorder %v4807_v33, inf  ;;  %vm999_vm6 = vcmp.eq.f32.partialorder %v4807_v33, 0.0 }
 0x17e   : > { %v3996_v11 = vpop.eup %3995  ;;  %4005 = vrsqrt.f32 %v4830_v10  ;;  %v4840_v39 = vadd.f32 %v834_v59, %v4553_v41  ;;  %v1196_v36 = vpack.c.bf16 %v1166_v54, %v1165_v25  ;;  %v1000_v51 = vand.u32 2147483648, %v4807_v33 }
 0x17f   : > { %v836_v3 = vpop.permute.xlu0 %835  ;;  %v1195_v31 = vpack.c.bf16 %v1164_v61, %v1163_v20  ;;  %v970_v58 = vsel %vm969_vm11, %v4776_v62, %v968_v50  ;;  %v975_v5 = vmul.f32 %v3996_v11, %v4780_v24  ;;  %vm1004_vm7 = vcmp.eq.f32.partialorder %v4816_v46, inf }
 0x180   : > { %v3998_v2 = vpop.eup %3997  ;;  %4007 = vrsqrt.f32 %v4840_v39  ;;  %v4851_v41 = vadd.f32 %v836_v3, %v4565_v44  ;;  %1558 = vrot.lane.b32.xlu1 %v1196_v36, %s4330_s22  ;;  %v973_v25 = vsel %vm971_vm12, %v972_v28, %v970_v58  ;;  %vm1006_vm8 = vcmp.eq.f32.partialorder %v4816_v46, 0.0 }
 0x181   : > { %v838_v53 = vpop.permute.xlu1 %837  ;;  %1556 = vrot.lane.b32.xlu0 %v1195_v31, %s4330_s22  ;;  %v977_v54 = vsel %vm976_vm13, %v4780_v24, %v975_v5  ;;  %v1167_v14 = vadd.f32 1e-08, %v973_v25  ;;  %v982_v59 = vmul.f32 %v3998_v2, %v4788_v13  ;;  %v1007_v44 = vand.u32 2147483648, %v4816_v46 }
 0x182   : > { %v4000_v20 = vpop.eup %3999  ;;  %4009 = vrsqrt.f32 %v4851_v41  ;;  %v4866_v62 = vadd.f32 %v838_v53, %v4579_v48  ;;  %v980_v28 = vsel %vm978_vm14, %v979_v6, %v977_v54  ;;  %vm1011_vm9 = vcmp.eq.f32.partialorder %v4830_v10, inf }
 0x183   : > { %v840_v61 = vpop.permute.xlu0 %839  ;;  %v1168_v50 = vadd.f32 1e-08, %v980_v28  ;;  %v984_v11 = vsel %vm983_vm15, %v4788_v13, %v982_v59  ;;  %v989_v36 = vmul.f32 %v4000_v20, %v4795_v22  ;;  %vm1013_vm10 = vcmp.eq.f32.partialorder %v4830_v10, 0.0 }
 0x184   : > { %v1014_v3 = vand.u32 2147483648, %v4830_v10  ;;  %v4002_v31 = vpop.eup %4001  ;;  %4011 = vrsqrt.f32 %v4866_v62  ;;  %v4879_v48 = vadd.f32 %v840_v61, %v4575_v47  ;;  %v987_v24 = vsel %vm985_vm1, %v986_v40, %v984_v11 }
 0x185   : > { %vm1018_vm11 = vcmp.eq.f32.partialorder %v4840_v39, inf  ;;  %v842_v6 = vpop.permute.xlu1 %841  ;;  %v1197_v58 = vpack.c.bf16 %v1168_v50, %v1167_v14  ;;  %v991_v5 = vsel %vm990_vm3, %v4795_v22, %v989_v36  ;;  %v1169_v2 = vadd.f32 1e-08, %v987_v24 }
 0x186   : > { %v996_v25 = vmul.f32 %v4002_v31, %v4807_v33  ;;  %v4004_v53 = vpop.eup %4003  ;;  %4013 = vrsqrt.f32 %v4879_v48  ;;  %v4890_v47 = vadd.f32 %v842_v6, %v4585_v49  ;;  %v994_v13 = vsel %vm992_vm4, %v993_v32, %v991_v5 }
 0x187   : > { %vm1020_vm12 = vcmp.eq.f32.partialorder %v4840_v39, 0.0  ;;  %v844_v40 = vpop.permute.xlu0 %843  ;;  %1560 = vrot.lane.b32.xlu0 %v1197_v58, %s4330_s22  ;;  %v1170_v54 = vadd.f32 1e-08, %v994_v13  ;;  %v1003_v59 = vmul.f32 %v4004_v53, %v4816_v46  ;;  %v1021_v20 = vand.u32 2147483648, %v4840_v39 }
 0x188   : > { %v998_v14 = vsel %vm997_vm5, %v4807_v33, %v996_v25  ;;  %v4006_v28 = vpop.eup %4005  ;;  %4015 = vrsqrt.f32 %v4890_v47  ;;  %v4903_v49 = vadd.f32 %v844_v40, %v4597_v52  ;;  %vm1025_vm13 = vcmp.eq.f32.partialorder %v4851_v41, inf }
 0x189   : > { %v1001_v22 = vsel %vm999_vm6, %v1000_v51, %v998_v14  ;;  %v846_v32 = vpop.permute.xlu1 %845  ;;  %v1198_v61 = vpack.c.bf16 %v1170_v54, %v1169_v2  ;;  %v1005_v50 = vsel %vm1004_vm7, %v4816_v46, %v1003_v59  ;;  %v1010_v36 = vmul.f32 %v4006_v28, %v4830_v10 }
 0x18a   : > { %v1171_v11 = vadd.f32 1e-08, %v1001_v22  ;;  %v4008_v31 = vpop.eup %4007  ;;  %4017 = vrsqrt.f32 %v4903_v49  ;;  %v4914_v52 = vadd.f32 %v846_v32, %v4611_v56  ;;  %v1008_v33 = vsel %vm1006_vm8, %v1007_v44, %v1005_v50 }
 0x18b   : > { %vm1027_vm14 = vcmp.eq.f32.partialorder %v4851_v41, 0.0  ;;  %v848_v51 = vpop.permute.xlu0 %847  ;;  %1562 = vrot.lane.b32.xlu1 %v1198_v61, %s4330_s22  ;;  %v1172_v24 = vadd.f32 1e-08, %v1008_v33  ;;  %v1012_v6 = vsel %vm1011_vm9, %v4830_v10, %v1010_v36  ;;  %v1017_v58 = vmul.f32 %v4008_v31, %v4840_v39 }
 0x18c   : > { %v1028_v5 = vand.u32 2147483648, %v4851_v41  ;;  %v4010_v2 = vpop.eup %4009  ;;  %4019 = vrsqrt.f32 %v4914_v52  ;;  %v4927_v46 = vadd.f32 %v848_v51, %v4607_v55  ;;  %v1015_v56 = vsel %vm1013_vm10, %v1014_v3, %v1012_v6 }
 0x18d   : > { %vm1032_vm15 = vcmp.eq.f32.partialorder %v4866_v62, inf  ;;  %v850_v44 = vpop.permute.xlu1 %849  ;;  %v1199_v25 = vpack.c.bf16 %v1172_v24, %v1171_v11  ;;  %v1019_v53 = vsel %vm1018_vm11, %v4840_v39, %v1017_v58  ;;  %v1173_v13 = vadd.f32 1e-08, %v1015_v56 }
 0x18e   : > { %v1024_v40 = vmul.f32 %v4010_v2, %v4851_v41  ;;  %v4012_v54 = vpop.eup %4011  ;;  %4021 = vrsqrt.f32 %v4927_v46  ;;  %v4938_v55 = vadd.f32 %v850_v44, %v4617_v57  ;;  %v1022_v10 = vsel %vm1020_vm12, %v1021_v20, %v1019_v53 }
 0x18f   : > { %vm1034_vm1 = vcmp.eq.f32.partialorder %v4866_v62, 0.0  ;;  %v852_v3 = vpop.permute.xlu0 %851  ;;  %1564 = vrot.lane.b32.xlu0 %v1199_v25, %s4330_s22  ;;  %v1174_v14 = vadd.f32 1e-08, %v1022_v10  ;;  %v1031_v28 = vmul.f32 %v4012_v54, %v4866_v62  ;;  %v1035_v22 = vand.u32 2147483648, %v4866_v62 }
 0x190   : > { %v1026_v59 = vsel %vm1025_vm13, %v4851_v41, %v1024_v40  ;;  %v4014_v32 = vpop.eup %4013  ;;  %4023 = vrsqrt.f32 %v4938_v55  ;;  %v4951_v57 = vadd.f32 %v852_v3, %v4629_v60  ;;  %vm1039_vm3 = vcmp.eq.f32.partialorder %v4879_v48, inf }
 0x191   : > { %v1029_v39 = vsel %vm1027_vm14, %v1028_v5, %v1026_v59  ;;  %v854_v20 = vpop.permute.xlu1 %853  ;;  %v1200_v61 = vpack.c.bf16 %v1174_v14, %v1173_v13  ;;  %v1033_v50 = vsel %vm1032_vm15, %v4866_v62, %v1031_v28  ;;  %v1038_v36 = vmul.f32 %v4014_v32, %v4879_v48 }
 0x192   : > { %v1175_v11 = vadd.f32 1e-08, %v1029_v39  ;;  %v4016_v31 = vpop.eup %4015  ;;  %4025 = vrsqrt.f32 %v4951_v57  ;;  %v4962_v60 = vadd.f32 %v854_v20, %v4643_v0  ;;  %v1036_v41 = vsel %vm1034_vm1, %v1035_v22, %v1033_v50 }
 0x193   : > { %vm1041_vm4 = vcmp.eq.f32.partialorder %v4879_v48, 0.0  ;;  %v856_v33 = vpop.permute.xlu0 %855  ;;  %1566 = vrot.lane.b32.xlu1 %v1200_v61, %s4330_s22  ;;  %v1176_v51 = vadd.f32 1e-08, %v1036_v41  ;;  %v1040_v24 = vsel %vm1039_vm3, %v4879_v48, %v1038_v36  ;;  %v1042_v6 = vand.u32 2147483648, %v4879_v48 }
 0x194   : > { %v1045_v58 = vmul.f32 %v4016_v31, %v4890_v47  ;;  %v4018_v5 = vpop.eup %4017  ;;  %4027 = vrsqrt.f32 %v4962_v60  ;;  %v4973_v0 = vadd.f32 %v856_v33, %v4639_v63  ;;  %vm1046_vm5 = vcmp.eq.f32.partialorder %v4890_v47, inf }
 0x195   : > { %vm1048_vm6 = vcmp.eq.f32.partialorder %v4890_v47, 0.0  ;;  %v858_v62 = vpop.permute.xlu1 %857  ;;  %v1201_v2 = vpack.c.bf16 %v1176_v51, %v1175_v11  ;;  %v1043_v56 = vsel %vm1041_vm4, %v1042_v6, %v1040_v24  ;;  %v1049_v25 = vand.u32 2147483648, %v4890_v47 }
 0x196   : > { %v1047_v44 = vsel %vm1046_vm5, %v4890_v47, %v1045_v58  ;;  %v4020_v48 = vpop.eup %4019  ;;  %4029 = vrsqrt.f32 %v4973_v0  ;;  %v4981_v53 = vadd.f32 %v858_v62, %v4649_v1  ;;  %v1177_v13 = vadd.f32 1e-08, %v1043_v56 }
 0x197   : > { %v1052_v63 = vmul.f32 %v4018_v5, %v4903_v49  ;;  %v860_v40 = vpop.permute.xlu0 %859  ;;  %1568 = vrot.lane.b32.xlu0 %v1201_v2, %s4330_s22  ;;  %v1050_v54 = vsel %vm1048_vm6, %v1049_v25, %v1047_v44  ;;  %vm1053_vm7 = vcmp.eq.f32.partialorder %v4903_v49, inf  ;;  %vm1055_vm8 = vcmp.eq.f32.partialorder %v4903_v49, 0.0 }
 0x198   : > { %v1056_v10 = vand.u32 2147483648, %v4903_v49  ;;  %v4022_v47 = vpop.eup %4021  ;;  %4031 = vrsqrt.f32 %v4981_v53  ;;  %v4990_v3 = vadd.f32 %v860_v40, %v4661_v4  ;;  %v1178_v1 = vadd.f32 1e-08, %v1050_v54 }
 0x199   : > { %v1054_v14 = vsel %vm1053_vm7, %v4903_v49, %v1052_v63  ;;  %v862_v59 = vpop.permute.xlu1 %861  ;;  %v1059_v22 = vmul.f32 %v4020_v48, %v4914_v52  ;;  %vm1060_vm9 = vcmp.eq.f32.partialorder %v4914_v52, inf  ;;  %vm1062_vm10 = vcmp.eq.f32.partialorder %v4914_v52, 0.0 }
 0x19a   : > { %v1057_v28 = vsel %vm1055_vm8, %v1056_v10, %v1054_v14  ;;  %v4024_v32 = vpop.eup %4023  ;;  %4033 = vrsqrt.f32 %v4990_v3  ;;  %v4998_v39 = vadd.f32 %v862_v59, %v4675_v8  ;;  %v1202_v20 = vpack.c.bf16 %v1178_v1, %v1177_v13 }
 0x19b   : > { %v1063_v4 = vand.u32 2147483648, %v4914_v52  ;;  %v864_v61 = vpop.permute.xlu0 %863  ;;  %v1061_v49 = vsel %vm1060_vm9, %v4914_v52, %v1059_v22  ;;  %v1179_v50 = vadd.f32 1e-08, %v1057_v28  ;;  %v1066_v11 = vmul.f32 %v4022_v47, %v4927_v46 }
 0x19c   : > { %vm1067_vm11 = vcmp.eq.f32.partialorder %v4927_v46, inf  ;;  %v4026_v36 = vpop.eup %4025  ;;  %4035 = vrsqrt.f32 %v4998_v39  ;;  %v5006_v31 = vadd.f32 %v864_v61, %v4671_v7  ;;  %1570 = vrot.lane.b32.xlu1 %v1202_v20, %s4330_s22  ;;  %vm1069_vm12 = vcmp.eq.f32.partialorder %v4927_v46, 0.0 }
 0x19d   : > { %v1064_v8 = vsel %vm1062_vm10, %v1063_v4, %v1061_v49  ;;  %v866_v41 = vpop.permute.xlu1 %865  ;;  %v1068_v52 = vsel %vm1067_vm11, %v4927_v46, %v1066_v11  ;;  %v1070_v51 = vand.u32 2147483648, %v4927_v46  ;;  %v1073_v24 = vmul.f32 %v4024_v32, %v4938_v55 }
 0x19e   : > { %v1180_v33 = vadd.f32 1e-08, %v1064_v8  ;;  %v4028_v6 = vpop.eup %4027  ;;  %4037 = vrsqrt.f32 %v5006_v31  ;;  %v5015_v58 = vadd.f32 %v866_v41, %v4681_v9  ;;  %vm1074_vm13 = vcmp.eq.f32.partialorder %v4938_v55, inf }
 0x19f   : > { %vm1076_vm14 = vcmp.eq.f32.partialorder %v4938_v55, 0.0  ;;  %v868_v5 = vpop.permute.xlu0 %867  ;;  %v1071_v62 = vsel %vm1069_vm12, %v1070_v51, %v1068_v52  ;;  %v1075_v2 = vsel %vm1074_vm13, %v4938_v55, %v1073_v24  ;;  %v1077_v56 = vand.u32 2147483648, %v4938_v55 }
 0x1a0   : > { %v1203_v7 = vpack.c.bf16 %v1180_v33, %v1179_v50  ;;  %v4030_v46 = vpop.eup %4029  ;;  %4039 = vrsqrt.f32 %v5015_v58  ;;  %v5023_v44 = vadd.f32 %v868_v5, %v4693_v12  ;;  %v1181_v25 = vadd.f32 1e-08, %v1071_v62 }
 0x1a1   : > { %v1080_v9 = vmul.f32 %v4026_v36, %v4951_v57  ;;  %v870_v48 = vpop.permute.xlu1 %869  ;;  %v1078_v13 = vsel %vm1076_vm14, %v1077_v56, %v1075_v2  ;;  %vm1081_vm15 = vcmp.eq.f32.partialorder %v4951_v57, inf  ;;  %vm1083_vm1 = vcmp.eq.f32.partialorder %v4951_v57, 0.0 }
 0x1a2   : > { %1572 = vrot.lane.b32.xlu0 %v1203_v7, %s4330_s22  ;;  %v1084_v63 = vand.u32 2147483648, %v4951_v57  ;;  %v4032_v55 = vpop.eup %4031  ;;  %4041 = vrsqrt.f32 %v5023_v44  ;;  %v5032_v40 = vadd.f32 %v870_v48, %v4707_v16  ;;  %v1182_v12 = vadd.f32 1e-08, %v1078_v13 }
 0x1a3   : > { %v1082_v54 = vsel %vm1081_vm15, %v4951_v57, %v1080_v9  ;;  %v872_v10 = vpop.permute.xlu0 %871  ;;  %v1087_v1 = vmul.f32 %v4028_v6, %v4962_v60  ;;  %vm1088_vm3 = vcmp.eq.f32.partialorder %v4962_v60, inf  ;;  %vm1090_vm4 = vcmp.eq.f32.partialorder %v4962_v60, 0.0 }
 0x1a4   : > { %v1085_v47 = vsel %vm1083_vm1, %v1084_v63, %v1082_v54  ;;  %v4034_v14 = vpop.eup %4033  ;;  %4043 = vrsqrt.f32 %v5032_v40  ;;  %v5040_v59 = vadd.f32 %v872_v10, %v4703_v15  ;;  %v1204_v28 = vpack.c.bf16 %v1182_v12, %v1181_v25 }
 0x1a5   : > { %v1091_v16 = vand.u32 2147483648, %v4962_v60  ;;  %v874_v22 = vpop.permute.xlu1 %873  ;;  %v1089_v57 = vsel %vm1088_vm3, %v4962_v60, %v1087_v1  ;;  %v1183_v32 = vadd.f32 1e-08, %v1085_v47  ;;  %v1094_v20 = vmul.f32 %v4030_v46, %v4973_v0 }
 0x1a6   : > { %vm1095_vm5 = vcmp.eq.f32.partialorder %v4973_v0, inf  ;;  %v4036_v4 = vpop.eup %4035  ;;  %4045 = vrsqrt.f32 %v5040_v59  ;;  %1574 = vrot.lane.b32.xlu1 %v1204_v28, %s4330_s22  ;;  %v5049_v61 = vadd.f32 %v874_v22, %v4713_v17  ;;  %vm1097_vm6 = vcmp.eq.f32.partialorder %v4973_v0, 0.0 }
 0x1a7   : > { %v1092_v15 = vsel %vm1090_vm4, %v1091_v16, %v1089_v57  ;;  %v1096_v50 = vsel %vm1095_vm5, %v4973_v0, %v1094_v20  ;;  %v1098_v60 = vand.u32 2147483648, %v4973_v0  ;;  %v1101_v11 = vmul.f32 %v4032_v55, %v4981_v53 }
 0x1a8   : > { %v1184_v49 = vadd.f32 1e-08, %v1092_v15  ;;  %v4038_v36 = vpop.eup %4037  ;;  %4047 = vrsqrt.f32 %v5049_v61  ;;  %vm1102_vm7 = vcmp.eq.f32.partialorder %v4981_v53, inf  ;;  %vm1104_vm8 = vcmp.eq.f32.partialorder %v4981_v53, 0.0 }
 0x1a9   : > { %v1105_v17 = vand.u32 2147483648, %v4981_v53  ;;  %v1099_v41 = vsel %vm1097_vm6, %v1098_v60, %v1096_v50  ;;  %v1103_v33 = vsel %vm1102_vm7, %v4981_v53, %v1101_v11  ;;  %v1108_v52 = vmul.f32 %v4034_v14, %v4990_v3 }
 0x1aa   : > { %v1205_v8 = vpack.c.bf16 %v1184_v49, %v1183_v32  ;;  %v4040_v51 = vpop.eup %4039  ;;  %v1185_v0 = vadd.f32 1e-08, %v1099_v41  ;;  %vm1109_vm9 = vcmp.eq.f32.partialorder %v4990_v3, inf  ;;  %vm1111_vm10 = vcmp.eq.f32.partialorder %v4990_v3, 0.0  ;;  %v3983_v32 = vld [vmem:[%s5917_s6] sm:$0xff]  }
 0x1ab   : > { %v1106_v24 = vsel %vm1104_vm8, %v1105_v17, %v1103_v33  ;;  %v1110_v7 = vsel %vm1109_vm9, %v4990_v3, %v1108_v52  ;;  %v1112_v5 = vand.u32 2147483648, %v4990_v3  ;;  %v1115_v62 = vmul.f32 %v4036_v4, %v4998_v39  ;;  %3723 = vmatprep.subr.bf16.mxu0 %v3983_v32 }
 0x1ac   : > { %1576 = vrot.lane.b32.xlu0 %v1205_v8, %s4330_s22  ;;  %v1186_v6 = vadd.f32 1e-08, %v1106_v24  ;;  %v4042_v2 = vpop.eup %4041  ;;  %vm1116_vm11 = vcmp.eq.f32.partialorder %v4998_v39, inf  ;;  %vm1118_vm12 = vcmp.eq.f32.partialorder %v4998_v39, 0.0  ;;  %v1119_v53 = vand.u32 2147483648, %v4998_v39  ;;  %3724 = vmatpush3.bf16.msra.mxu0 %v3983_v32 }
 0x1ad   : > { %v1122_v56 = vmul.f32 %v4038_v36, %v5006_v31  ;;  %v1113_v25 = vsel %vm1111_vm10, %v1112_v5, %v1110_v7  ;;  %v1117_v9 = vsel %vm1116_vm11, %v4998_v39, %v1115_v62  ;;  %vm1123_vm13 = vcmp.eq.f32.partialorder %v5006_v31, inf }
 0x1ae   : > { %v1206_v46 = vpack.c.bf16 %v1186_v6, %v1185_v0  ;;  %v4044_v48 = vpop.eup %4043  ;;  %v1120_v13 = vsel %vm1118_vm12, %v1119_v53, %v1117_v9  ;;  %v1187_v3 = vadd.f32 1e-08, %v1113_v25  ;;  %vm1125_vm14 = vcmp.eq.f32.partialorder %v5006_v31, 0.0 }
 0x1af   : > { %v1124_v63 = vsel %vm1123_vm13, %v5006_v31, %v1122_v56  ;;  %v1188_v55 = vadd.f32 1e-08, %v1120_v13  ;;  %v1126_v12 = vand.u32 2147483648, %v5006_v31  ;;  %v1129_v54 = vmul.f32 %v4040_v51, %v5015_v58 }
 0x1b0   : > { %1578 = vrot.lane.b32.xlu1 %v1206_v46, %s4330_s22  ;;  %v4046_v10 = vpop.eup %4045  ;;  %vm1130_vm15 = vcmp.eq.f32.partialorder %v5015_v58, inf  ;;  %vm1132_vm1 = vcmp.eq.f32.partialorder %v5015_v58, 0.0  ;;  %v1133_v39 = vand.u32 2147483648, %v5015_v58  ;;  %v1136_v47 = vmul.f32 %v4042_v2, %v5023_v44 }
 0x1b1   : > { %v1207_v1 = vpack.c.bf16 %v1188_v55, %v1187_v3  ;;  %v1127_v14 = vsel %vm1125_vm14, %v1126_v12, %v1124_v63  ;;  %v1131_v28 = vsel %vm1130_vm15, %v5015_v58, %v1129_v54  ;;  %vm1137_vm3 = vcmp.eq.f32.partialorder %v5023_v44, inf }
 0x1b2   : > { %v4048_v16 = vpop.eup %4047  ;;  %v1134_v22 = vsel %vm1132_vm1, %v1133_v39, %v1131_v28  ;;  %v1138_v31 = vsel %vm1137_vm3, %v5023_v44, %v1136_v47  ;;  %vm1139_vm4 = vcmp.eq.f32.partialorder %v5023_v44, 0.0  ;;  %v1140_v57 = vand.u32 2147483648, %v5023_v44  ;;  %v5131_v39 = vld [vmem:[%s5916_s5] ss:$0 sm:$0xff] }
 0x1b3   : > { %1580 = vrot.lane.b32.xlu0 %v1207_v1, %s4330_s22  ;;  %v1189_v20 = vadd.f32 1e-08, %v1127_v14  ;;  %v1190_v4 = vadd.f32 1e-08, %v1134_v22  ;;  %v1143_v58 = vmul.f32 %v4044_v48, %v5032_v40  ;;  %vm1144_vm5 = vcmp.eq.f32.partialorder %v5032_v40, inf }
 0x1b4   : > { %v1141_v15 = vsel %vm1139_vm4, %v1140_v57, %v1138_v31  ;;  %vm1146_vm6 = vcmp.eq.f32.partialorder %v5032_v40, 0.0  ;;  %v1147_v49 = vand.u32 2147483648, %v5032_v40  ;;  %v1150_v50 = vmul.f32 %v4046_v10, %v5040_v59  ;;  %v3984_v10 = vld [vmem:[%s5917_s6 + $0x8] sm:$0xff]  }
 0x1b5   : > { %v1208_v44 = vpack.c.bf16 %v1190_v4, %v1189_v20  ;;  %v1145_v60 = vsel %vm1144_vm5, %v5032_v40, %v1143_v58  ;;  %v1191_v11 = vadd.f32 1e-08, %v1141_v15  ;;  %vm1151_vm7 = vcmp.eq.f32.partialorder %v5040_v59, inf  ;;  %3725 = vmatprep.subr.bf16.mxu0 %v3984_v10 }
 0x1b6   : > { %v1148_v36 = vsel %vm1146_vm6, %v1147_v49, %v1145_v60  ;;  %v1152_v17 = vsel %vm1151_vm7, %v5040_v59, %v1150_v50  ;;  %v1154_v8 = vand.u32 2147483648, %v5040_v59  ;;  %v1157_v41 = vmul.f32 %v4048_v16, %v5049_v61  ;;  %3726 = vmatpush3.bf16.msra.mxu0 %v3984_v10 }
 0x1b7   : > { %1582 = vrot.lane.b32.xlu1 %v1208_v44, %s4330_s22  ;;  %v1192_v33 = vadd.f32 1e-08, %v1148_v36  ;;  %vm1153_vm8 = vcmp.eq.f32.partialorder %v5040_v59, 0.0  ;;  %vm1158_vm9 = vcmp.eq.f32.partialorder %v5049_v61, inf  ;;  %v1161_v40 = vand.u32 2147483648, %v5049_v61 }
 0x1b8   : > { %v1155_v52 = vsel %vm1153_vm8, %v1154_v8, %v1152_v17  ;;  %v1159_v51 = vsel %vm1158_vm9, %v5049_v61, %v1157_v41  ;;  %vm1160_vm10 = vcmp.eq.f32.partialorder %v5049_v61, 0.0  ;;  %vm1594_vm11 = vcmask 130048  }
 0x1b9   : > { %v1209_v24 = vpack.c.bf16 %v1192_v33, %v1191_v11  ;;  %v1162_v0 = vsel %vm1160_vm10, %v1161_v40, %v1159_v51  ;;  %v1193_v6 = vadd.f32 1e-08, %v1155_v52 }
 0x1ba   : > { %v1194_v7 = vadd.f32 1e-08, %v1162_v0 }
 0x1bb   : > { %1584 = vrot.lane.b32.xlu0 %v1209_v24, %s4330_s22 }
 0x1bc   : > { %v1210_v5 = vpack.c.bf16 %v1194_v7, %v1193_v6 }
 0x1be   : > { %1586 = vrot.lane.b32.xlu1 %v1210_v5, %s4330_s22  ;;  %s2711_s22 = ssub.s32 (%p4408_p4), 63, %s4416_s20 }
 0x1bf   : > { %p2712_p8 = scmp.lt.s32.totalorder (%p4408_p4), %s2711_s22, 32 }
 0x1f2   : > { %v1559_v62 = vpop.permute.xlu1 %1558 }
 0x1f3   : > { %v1557_v59 = vpop.permute.xlu0 %1556 }
 0x1f4   : > { %3691 = vmatprep.mubr.msk.bf16.mxu1 %vm1594_vm11, %v1557_v59 }
 0x1f5   : > { %3692 = vmatmul.mubr.msk.bf16.vlgmr.msra.gmra.mrb[0].mxu1 %vm1594_vm11, %v1559_v62 }
 0x1f9   : > { %v1561_v2 = vpop.permute.xlu0 %1560 }
 0x1fa   : > { %3695 = vmatprep.mubr.msk.bf16.mxu1 %vm1594_vm11, %v1561_v2 }
 0x1fd   : > { %v1563_v61 = vpop.permute.xlu1 %1562 }
 0x1fe   : > { %3696 = vmatmul.mubr.msk.bf16.gmra.mrb[4].mxu1 %vm1594_vm11, %v1563_v61 }
 0x201   : > { %v1565_v53 = vpop.permute.xlu0 %1564 }
 0x202   : > { %3699 = vmatprep.mubr.msk.bf16.mxu1 %vm1594_vm11, %v1565_v53 }
 0x205   : > { %v1567_v56 = vpop.permute.xlu1 %1566 }
 0x206   : > { %3700 = vmatmul.mubr.msk.bf16.gmra.mrb[8].mxu1 %vm1594_vm11, %v1567_v56 }
 0x209   : > { %v1569_v46 = vpop.permute.xlu0 %1568 }
 0x20a   : > { %3703 = vmatprep.mubr.msk.bf16.mxu1 %vm1594_vm11, %v1569_v46 }
 0x20e   : > { %v1571_v25 = vpop.permute.xlu1 %1570 }
 0x20f   : > { %3704 = vmatmul.mubr.msk.bf16.gmra.mrb[12].mxu1 %vm1594_vm11, %v1571_v25 }
 0x214   : > { %v1573_v9 = vpop.permute.xlu0 %1572 }
 0x215   : > { %3707 = vmatprep.mubr.msk.bf16.mxu1 %vm1594_vm11, %v1573_v9 }
 0x218   : > { %v1575_v48 = vpop.permute.xlu1 %1574 }
 0x219   : > { %3708 = vmatmul.mubr.msk.bf16.gmra.mrb[16].mxu1 %vm1594_vm11, %v1575_v48 }
 0x21e   : > { %v1577_v13 = vpop.permute.xlu0 %1576 }
 0x21f   : > { %3711 = vmatprep.mubr.msk.bf16.mxu1 %vm1594_vm11, %v1577_v13 }
 0x222   : > { %v1579_v3 = vpop.permute.xlu1 %1578 }
 0x223   : > { %3712 = vmatmul.mubr.msk.bf16.gmra.mrb[20].mxu1 %vm1594_vm11, %v1579_v3 }
 0x225   : > { %v1581_v63 = vpop.permute.xlu0 %1580 }
 0x226   : > { %3715 = vmatprep.mubr.msk.bf16.mxu1 %vm1594_vm11, %v1581_v63 }
 0x229   : > { %v1583_v55 = vpop.permute.xlu1 %1582 }
 0x22b   : > { %3716 = vmatmul.mubr.msk.bf16.gmra.mrb[24].mxu1 %vm1594_vm11, %v1583_v55 }
 0x22d   : > { %v1585_v12 = vpop.permute.xlu0 %1584 }
 0x22e   : > { %3719 = vmatprep.mubr.msk.bf16.mxu1 %vm1594_vm11, %v1585_v12 }
 0x230   : > { %v1587_v54 = vpop.permute.xlu1 %1586 }
 0x233   : > { %3720 = vmatmul.mubr.msk.bf16.gmra.mrb[28].mxu1 %vm1594_vm11, %v1587_v54 }
 0x2c8   : > { %v3693_v47 = vpop.f32.mrb[0].mxu1 }
 0x2c9   : > { %v5134_v1 = vadd.f32 %v3693_v47, %v5131_v39  ;;  %v1677_v14 = vpop.f32.mrb[1].mxu1 }
 0x2ca   : > { %v5137_v28 = vadd.f32 %v5131_v39, %v1677_v14  ;;  %v3694_v16 = vpop.f32.mrb[2].mxu1 }
 0x2cb   : > { %v3462_v22 = vmul.f32 -1.442695, %v5134_v1  ;;  %v5141_v31 = vadd.f32 %v3694_v16, %v5131_v39  ;;  %v1680_v57 = vpop.f32.mrb[3].mxu1 }
 0x2cc   : > { %v3460_v32 = vmul.f32 -1.442695, %v5137_v28  ;;  %v5145_v20 = vadd.f32 %v5131_v39, %v1680_v57 }
 0x2cd   : > { %4049 = vpow2.f32 %v3462_v22  ;;  %v3463_v4 = vmul.f32 -1.442695, %v5141_v31 }
 0x2ce   : > { %4051 = vpow2.f32 %v3460_v32  ;;  %v3461_v58 = vmul.f32 -1.442695, %v5145_v20 }
 0x2cf   : > { %4053 = vpow2.f32 %v3463_v4 }
 0x2d0   : > { %4055 = vpow2.f32 %v3461_v58 }
 0x2d1   : > { %v3697_v15 = vpop.f32.mrb[4].mxu1 }
 0x2d2   : > { %v5150_v49 = vadd.f32 %v3697_v15, %v5131_v39  ;;  %v1693_v50 = vpop.f32.mrb[5].mxu1 }
 0x2d3   : > { %v5153_v44 = vadd.f32 %v5131_v39, %v1693_v50  ;;  %v3698_v60 = vpop.f32.mrb[6].mxu1 }
 0x2d4   : > { %v3466_v11 = vmul.f32 -1.442695, %v5150_v49  ;;  %v5157_v36 = vadd.f32 %v3698_v60, %v5131_v39  ;;  %v1696_v17 = vpop.f32.mrb[7].mxu1 }
 0x2d5   : > { %v3464_v8 = vmul.f32 -1.442695, %v5153_v44  ;;  %v5161_v41 = vadd.f32 %v5131_v39, %v1696_v17 }
 0x2d6   : > { %4057 = vpow2.f32 %v3466_v11  ;;  %v3467_v33 = vmul.f32 -1.442695, %v5157_v36 }
 0x2d7   : > { %v4050_v40 = vpop.eup %4049  ;;  %4059 = vpow2.f32 %v3464_v8  ;;  %v3465_v52 = vmul.f32 -1.442695, %v5161_v41 }
 0x2d8   : > { %v4052_v51 = vpop.eup %4051  ;;  %v1941_v24 = vadd.f32 1.0, %v4050_v40  ;;  %4061 = vpow2.f32 %v3467_v33 }
 0x2d9   : > { %v4054_v0 = vpop.eup %4053  ;;  %v1939_v6 = vadd.f32 1.0, %v4052_v51  ;;  %4063 = vpow2.f32 %v3465_v52  ;;  %v3701_v7 = vpop.f32.mrb[8].mxu1 }
 0x2da   : > { %v4056_v5 = vpop.eup %4055  ;;  %4065 = vrcp.f32 %v1941_v24  ;;  %v1942_v59 = vadd.f32 1.0, %v4054_v0  ;;  %v5166_v62 = vadd.f32 %v3701_v7, %v5131_v39  ;;  %v1709_v2 = vpop.f32.mrb[9].mxu1 }
 0x2db   : > { %4067 = vrcp.f32 %v1939_v6  ;;  %v1940_v61 = vadd.f32 1.0, %v4056_v5  ;;  %v5169_v53 = vadd.f32 %v5131_v39, %v1709_v2  ;;  %v3702_v56 = vpop.f32.mrb[10].mxu1 }
 0x2dc   : > { %4069 = vrcp.f32 %v1942_v59  ;;  %v3470_v46 = vmul.f32 -1.442695, %v5166_v62  ;;  %v5173_v25 = vadd.f32 %v3702_v56, %v5131_v39  ;;  %v1712_v9 = vpop.f32.mrb[11].mxu1 }
 0x2dd   : > { %4071 = vrcp.f32 %v1940_v61  ;;  %v3468_v48 = vmul.f32 -1.442695, %v5169_v53  ;;  %v5177_v13 = vadd.f32 %v5131_v39, %v1712_v9 }
 0x2de   : > { %4073 = vpow2.f32 %v3470_v46  ;;  %v3471_v3 = vmul.f32 -1.442695, %v5173_v25 }
 0x2df   : > { %4075 = vpow2.f32 %v3468_v48  ;;  %v3469_v63 = vmul.f32 -1.442695, %v5177_v13 }
 0x2e0   : > { %v4058_v55 = vpop.eup %4057  ;;  %4077 = vpow2.f32 %v3471_v3 }
 0x2e1   : > { %v4060_v12 = vpop.eup %4059  ;;  %v1945_v54 = vadd.f32 1.0, %v4058_v55  ;;  %4079 = vpow2.f32 %v3469_v63 }
 0x2e2   : > { %v4062_v10 = vpop.eup %4061  ;;  %v1943_v47 = vadd.f32 1.0, %v4060_v12  ;;  %v3705_v14 = vpop.f32.mrb[12].mxu1 }
 0x2e3   : > { %v4064_v16 = vpop.eup %4063  ;;  %4081 = vrcp.f32 %v1945_v54  ;;  %v1946_v22 = vadd.f32 1.0, %v4062_v10  ;;  %v5182_v57 = vadd.f32 %v3705_v14, %v5131_v39  ;;  %v1725_v32 = vpop.f32.mrb[13].mxu1 }
 0x2e4   : > { %v4066_v4 = vpop.eup %4065  ;;  %4083 = vrcp.f32 %v1943_v47  ;;  %v1944_v58 = vadd.f32 1.0, %v4064_v16  ;;  %v5185_v15 = vadd.f32 %v5131_v39, %v1725_v32  ;;  %v3706_v50 = vpop.f32.mrb[14].mxu1 }
 0x2e5   : > { %v4068_v60 = vpop.eup %4067  ;;  %4085 = vrcp.f32 %v1946_v22  ;;  %v3474_v11 = vmul.f32 -1.442695, %v5182_v57  ;;  %v5189_v17 = vadd.f32 %v3706_v50, %v5131_v39  ;;  %v1728_v8 = vpop.f32.mrb[15].mxu1  ;;  %v2037_v24 = vmul.f32 %v4066_v4, %v5134_v1 }
 0x2e6   : > { %v4070_v33 = vpop.eup %4069  ;;  %4087 = vrcp.f32 %v1944_v58  ;;  %v3472_v40 = vmul.f32 -1.442695, %v5185_v15  ;;  %v5193_v52 = vadd.f32 %v5131_v39, %v1728_v8  ;;  %v2035_v5 = vmul.f32 %v4068_v60, %v5137_v28 }
 0x2e7   : > { %v4072_v51 = vpop.eup %4071  ;;  %v2038_v0 = vmul.f32 %v4070_v33, %v5141_v31  ;;  %4089 = vpow2.f32 %v3474_v11  ;;  %v3475_v6 = vmul.f32 -1.442695, %v5189_v17 }
 0x2e8   : > { %v4074_v7 = vpop.eup %4073  ;;  %v2036_v59 = vmul.f32 %v4072_v51, %v5145_v20  ;;  %4091 = vpow2.f32 %v3472_v40  ;;  %v3473_v2 = vmul.f32 -1.442695, %v5193_v52 }
 0x2e9   : > { %v4076_v61 = vpop.eup %4075  ;;  %v2068_v56 = vpack.c.bf16 %v2038_v0, %v2037_v24  ;;  %v1949_v46 = vadd.f32 1.0, %v4074_v7  ;;  %4093 = vpow2.f32 %v3475_v6 }
 0x2ea   : > { %v4078_v9 = vpop.eup %4077  ;;  %v2067_v48 = vpack.c.bf16 %v2036_v59, %v2035_v5  ;;  %v1947_v1 = vadd.f32 1.0, %v4076_v61  ;;  %4095 = vpow2.f32 %v3473_v2 }
 0x2eb   : > { %v4080_v31 = vpop.eup %4079  ;;  %4097 = vrcp.f32 %v1949_v46  ;;  %v1950_v3 = vadd.f32 1.0, %v4078_v9 }
 0x2ec   : > { %4099 = vrcp.f32 %v1947_v1  ;;  %v1948_v63 = vadd.f32 1.0, %v4080_v31  ;;  %v3709_v55 = vpop.f32.mrb[16].mxu1  ;;  %3727 = vmatprep.mubr.msk.bf16.mxu0 %vm537_vm0, %v2067_v48 }
 0x2ed   : > { %v4082_v28 = vpop.eup %4081  ;;  %4101 = vrcp.f32 %v1950_v3  ;;  %v5203_v20 = vadd.f32 %v3709_v55, %v5131_v39  ;;  %v1741_v12 = vpop.f32.mrb[17].mxu1  ;;  %3728 = vmatmul.mubr.msk.bf16.vlgmr.msra.gmra.mrb[32].mxu0 %vm537_vm0, %v2068_v56 }
 0x2ee   : > { %v4084_v54 = vpop.eup %4083  ;;  %4103 = vrcp.f32 %v1948_v63  ;;  %v5207_v10 = vadd.f32 %v5131_v39, %v1741_v12  ;;  %v3710_v47 = vpop.f32.mrb[18].mxu1  ;;  %v2041_v58 = vmul.f32 %v4082_v28, %v5150_v49 }
 0x2ef   : > { %v4086_v14 = vpop.eup %4085  ;;  %v3478_v16 = vmul.f32 -1.442695, %v5203_v20  ;;  %v5211_v22 = vadd.f32 %v3710_v47, %v5131_v39  ;;  %v1744_v32 = vpop.f32.mrb[19].mxu1  ;;  %v2039_v33 = vmul.f32 %v4084_v54, %v5153_v44 }
 0x2f0   : > { %v4088_v4 = vpop.eup %4087  ;;  %v2042_v50 = vmul.f32 %v4086_v14, %v5157_v36  ;;  %v3476_v60 = vmul.f32 -1.442695, %v5207_v10  ;;  %v5217_v11 = vadd.f32 %v5131_v39, %v1744_v32 }
 0x2f1   : > { %v4090_v8 = vpop.eup %4089  ;;  %v2040_v40 = vmul.f32 %v4088_v4, %v5161_v41  ;;  %4105 = vpow2.f32 %v3478_v16  ;;  %v3479_v51 = vmul.f32 -1.442695, %v5211_v22 }
 0x2f2   : > { %v4092_v24 = vpop.eup %4091  ;;  %v2070_v0 = vpack.c.bf16 %v2042_v50, %v2041_v58  ;;  %v1953_v6 = vadd.f32 1.0, %v4090_v8  ;;  %4107 = vpow2.f32 %v3476_v60  ;;  %v3477_v2 = vmul.f32 -1.442695, %v5217_v11 }
 0x2f3   : > { %v4094_v49 = vpop.eup %4093  ;;  %v2069_v7 = vpack.c.bf16 %v2040_v40, %v2039_v33  ;;  %v1951_v36 = vadd.f32 1.0, %v4092_v24  ;;  %4109 = vpow2.f32 %v3479_v51 }
 0x2f4   : > { %v4096_v5 = vpop.eup %4095  ;;  %4111 = vrcp.f32 %v1953_v6  ;;  %v1954_v59 = vadd.f32 1.0, %v4094_v49 }
 0x2f5   : > { %v4098_v61 = vpop.eup %4097  ;;  %4113 = vrcp.f32 %v1951_v36  ;;  %v1952_v44 = vadd.f32 1.0, %v4096_v5  ;;  %3731 = vmatprep.mubr.msk.bf16.mxu0 %vm537_vm0, %v2069_v7 }
 0x2f6   : > { %v3713_v41 = vpop.f32.mrb[20].mxu1  ;;  %v4100_v56 = vpop.eup %4099  ;;  %4115 = vrcp.f32 %v1954_v59  ;;  %3732 = vmatmul.mubr.msk.bf16.gmra.mrb[36].mxu0 %vm537_vm0, %v2070_v0  ;;  %v2045_v1 = vmul.f32 %v4098_v61, %v5166_v62 }
 0x2f7   : > { %v5225_v46 = vadd.f32 %v3713_v41, %v5131_v39  ;;  %v1757_v9 = vpop.f32.mrb[21].mxu1  ;;  %v4102_v48 = vpop.eup %4101  ;;  %4117 = vrcp.f32 %v1952_v44  ;;  %v2043_v47 = vmul.f32 %v4100_v56, %v5169_v53 }
 0x2f8   : > { %v5230_v31 = vadd.f32 %v5131_v39, %v1757_v9  ;;  %v3714_v3 = vpop.f32.mrb[22].mxu1  ;;  %v4104_v63 = vpop.eup %4103  ;;  %v2046_v55 = vmul.f32 %v4102_v48, %v5173_v25  ;;  %4119 = vpow2.f32 %v3477_v2 }
 0x2f9   : > { %v3482_v28 = vmul.f32 -1.442695, %v5225_v46  ;;  %v5235_v12 = vadd.f32 %v3714_v3, %v5131_v39  ;;  %v1760_v54 = vpop.f32.mrb[23].mxu1  ;;  %v2044_v14 = vmul.f32 %v4104_v63, %v5177_v13 }
 0x2fa   : > { %v3480_v62 = vmul.f32 -1.442695, %v5230_v31  ;;  %v5241_v16 = vadd.f32 %v5131_v39, %v1760_v54  ;;  %v2072_v32 = vpack.c.bf16 %v2046_v55, %v2045_v1 }
 0x2fb   : > { %4121 = vpow2.f32 %v3482_v28  ;;  %v3483_v25 = vmul.f32 -1.442695, %v5235_v12  ;;  %v4106_v4 = vpop.eup %4105  ;;  %v2071_v58 = vpack.c.bf16 %v2044_v14, %v2043_v47 }
 0x2fc   : > { %4123 = vpow2.f32 %v3480_v62  ;;  %v3481_v50 = vmul.f32 -1.442695, %v5241_v16  ;;  %v4108_v60 = vpop.eup %4107  ;;  %v1957_v8 = vadd.f32 1.0, %v4106_v4 }
 0x2fd   : > { %4125 = vpow2.f32 %v3483_v25  ;;  %v4110_v53 = vpop.eup %4109  ;;  %v1955_v33 = vadd.f32 1.0, %v4108_v60  ;;  %3735 = vmatprep.mubr.msk.bf16.mxu0 %vm537_vm0, %v2071_v58 }
 0x2fe   : > { %4127 = vpow2.f32 %v3481_v50  ;;  %v3717_v13 = vpop.f32.mrb[24].mxu1  ;;  %v4112_v40 = vpop.eup %4111  ;;  %v1958_v51 = vadd.f32 1.0, %v4110_v53  ;;  %3736 = vmatmul.mubr.msk.bf16.gmra.mrb[40].mxu0 %vm537_vm0, %v2072_v32 }
 0x2ff   : > { %4129 = vrcp.f32 %v1957_v8  ;;  %v5247_v24 = vadd.f32 %v3717_v13, %v5131_v39  ;;  %v1773_v0 = vpop.f32.mrb[25].mxu1  ;;  %v4114_v6 = vpop.eup %4113  ;;  %v2049_v5 = vmul.f32 %v4112_v40, %v5182_v57 }
 0x300   : > { %v5251_v49 = vadd.f32 %v5131_v39, %v1773_v0  ;;  %v3718_v7 = vpop.f32.mrb[26].mxu1  ;;  %v4116_v36 = vpop.eup %4115  ;;  %4131 = vrcp.f32 %v1958_v51  ;;  %v2047_v1 = vmul.f32 %v4114_v6, %v5185_v15 }
 0x301   : > { %v3486_v59 = vmul.f32 -1.442695, %v5247_v24  ;;  %v5256_v2 = vadd.f32 %v3718_v7, %v5131_v39  ;;  %v1776_v61 = vpop.f32.mrb[27].mxu1  ;;  %v4118_v44 = vpop.eup %4117  ;;  %v2050_v41 = vmul.f32 %v4116_v36, %v5189_v17  ;;  %4133 = vrcp.f32 %v1955_v33 }
 0x302   : > { %v3484_v56 = vmul.f32 -1.442695, %v5251_v49  ;;  %v5261_v9 = vadd.f32 %v5131_v39, %v1776_v61  ;;  %v4120_v48 = vpop.eup %4119  ;;  %v2048_v57 = vmul.f32 %v4118_v44, %v5193_v52 }
 0x303   : > { %4135 = vpow2.f32 %v3486_v59  ;;  %v3487_v3 = vmul.f32 -1.442695, %v5256_v2  ;;  %v2074_v63 = vpack.c.bf16 %v2050_v41, %v2049_v5  ;;  %v1956_v55 = vadd.f32 1.0, %v4120_v48 }
 0x304   : > { %4137 = vpow2.f32 %v3484_v56  ;;  %v3485_v28 = vmul.f32 -1.442695, %v5261_v9  ;;  %v2073_v54 = vpack.c.bf16 %v2048_v57, %v2047_v1 }
 0x305   : > { %v4122_v17 = vpop.eup %4121  ;;  %4139 = vpow2.f32 %v3487_v3 }
 0x306   : > { %v4124_v47 = vpop.eup %4123  ;;  %4141 = vrcp.f32 %v1956_v55  ;;  %v1961_v14 = vadd.f32 1.0, %v4122_v17  ;;  %v3721_v62 = vpop.f32.mrb[28].mxu1  ;;  %3739 = vmatprep.mubr.msk.bf16.mxu0 %vm537_vm0, %v2073_v54 }
 0x307   : > { %v4126_v32 = vpop.eup %4125  ;;  %v1959_v25 = vadd.f32 1.0, %v4124_v47  ;;  %4143 = vpow2.f32 %v3485_v28  ;;  %v5268_v15 = vadd.f32 %v3721_v62, %v5131_v39  ;;  %v1789_v52 = vpop.f32.mrb[29].mxu1  ;;  %3740 = vmatmul.mubr.msk.bf16.gmra.mrb[44].mxu0 %vm537_vm0, %v2074_v63 }
 0x308   : > { %v4128_v4 = vpop.eup %4127  ;;  %4145 = vrcp.f32 %v1961_v14  ;;  %v1962_v58 = vadd.f32 1.0, %v4126_v32  ;;  %v5272_v50 = vadd.f32 %v5131_v39, %v1789_v52  ;;  %v3722_v60 = vpop.f32.mrb[30].mxu1 }
 0x309   : > { %v4130_v8 = vpop.eup %4129  ;;  %4147 = vrcp.f32 %v1959_v25  ;;  %v1960_v53 = vadd.f32 1.0, %v4128_v4  ;;  %v3490_v33 = vmul.f32 -1.442695, %v5268_v15  ;;  %v5277_v13 = vadd.f32 %v3722_v60, %v5131_v39  ;;  %v1792_v40 = vpop.f32.mrb[31].mxu1 }
 0x30a   : > { %4149 = vrcp.f32 %v1962_v58  ;;  %v3488_v51 = vmul.f32 -1.442695, %v5272_v50  ;;  %v5281_v0 = vadd.f32 %v5131_v39, %v1792_v40  ;;  %v4132_v6 = vpop.eup %4131  ;;  %v2053_v5 = vmul.f32 %v4130_v8, %v5203_v20 }
 0x30b   : > { %4151 = vrcp.f32 %v1960_v53  ;;  %v3491_v7 = vmul.f32 -1.442695, %v5277_v13  ;;  %v4134_v36 = vpop.eup %4133  ;;  %v2054_v59 = vmul.f32 %v4132_v6, %v5211_v22 }
 0x30c   : > { %4153 = vpow2.f32 %v3490_v33  ;;  %v3489_v61 = vmul.f32 -1.442695, %v5281_v0  ;;  %v2051_v20 = vmul.f32 %v4134_v36, %v5207_v10 }
 0x30d   : > { %v4136_v44 = vpop.eup %4135  ;;  %4155 = vpow2.f32 %v3488_v51  ;;  %v2076_v56 = vpack.c.bf16 %v2054_v59, %v2053_v5 }
 0x30e   : > { %v4138_v41 = vpop.eup %4137  ;;  %v1965_v48 = vadd.f32 1.0, %v4136_v44  ;;  %4157 = vpow2.f32 %v3491_v7 }
 0x30f   : > { %v4140_v39 = vpop.eup %4139  ;;  %v1963_v1 = vadd.f32 1.0, %v4138_v41  ;;  %4159 = vpow2.f32 %v3489_v61 }
 0x310   : > { %v4142_v57 = vpop.eup %4141  ;;  %4161 = vrcp.f32 %v1965_v48  ;;  %v1966_v3 = vadd.f32 1.0, %v4140_v39 }
 0x311   : > { %v4144_v63 = vpop.eup %4143  ;;  %v2052_v22 = vmul.f32 %v4142_v57, %v5217_v11  ;;  %4163 = vrcp.f32 %v1963_v1 }
 0x312   : > { %v4146_v55 = vpop.eup %4145  ;;  %4165 = vrcp.f32 %v1966_v3  ;;  %v1964_v28 = vadd.f32 1.0, %v4144_v63 }
 0x313   : > { %v4148_v17 = vpop.eup %4147  ;;  %v2075_v54 = vpack.c.bf16 %v2052_v22, %v2051_v20  ;;  %v2057_v62 = vmul.f32 %v4146_v55, %v5225_v46 }
 0x314   : > { %v4150_v47 = vpop.eup %4149  ;;  %4167 = vrcp.f32 %v1964_v28  ;;  %v2055_v10 = vmul.f32 %v4148_v17, %v5230_v31 }
 0x315   : > { %v4152_v14 = vpop.eup %4151  ;;  %v2058_v32 = vmul.f32 %v4150_v47, %v5235_v12  ;;  %3743 = vmatprep.mubr.msk.bf16.mxu0 %vm537_vm0, %v2075_v54 }
 0x316   : > { %v4154_v25 = vpop.eup %4153  ;;  %v2056_v11 = vmul.f32 %v4152_v14, %v5241_v16  ;;  %3744 = vmatmul.mubr.msk.bf16.gmra.mrb[48].mxu0 %vm537_vm0, %v2076_v56 }
 0x317   : > { %v4156_v52 = vpop.eup %4155  ;;  %v2078_v4 = vpack.c.bf16 %v2058_v32, %v2057_v62  ;;  %v1969_v58 = vadd.f32 1.0, %v4154_v25 }
 0x318   : > { %v4158_v60 = vpop.eup %4157  ;;  %v2077_v8 = vpack.c.bf16 %v2056_v11, %v2055_v10  ;;  %v1967_v53 = vadd.f32 1.0, %v4156_v52 }
 0x319   : > { %v4160_v33 = vpop.eup %4159  ;;  %4169 = vrcp.f32 %v1969_v58  ;;  %v1970_v46 = vadd.f32 1.0, %v4158_v60 }
 0x31a   : > { %v4162_v40 = vpop.eup %4161  ;;  %4171 = vrcp.f32 %v1967_v53  ;;  %v1968_v12 = vadd.f32 1.0, %v4160_v33  ;;  %3747 = vmatprep.mubr.msk.bf16.mxu0 %vm537_vm0, %v2077_v8 }
 0x31b   : > { %v4164_v51 = vpop.eup %4163  ;;  %4173 = vrcp.f32 %v1970_v46  ;;  %v2061_v16 = vmul.f32 %v4162_v40, %v5247_v24 }
 0x31c   : > { %v4166_v31 = vpop.eup %4165  ;;  %4175 = vrcp.f32 %v1968_v12  ;;  %v2059_v36 = vmul.f32 %v4164_v51, %v5251_v49 }
 0x31d   : > { %v2062_v6 = vmul.f32 %v4166_v31, %v5256_v2 }
 0x31e   : > { %v4168_v7 = vpop.eup %4167  ;;  %3748 = vmatmul.mubr.msk.bf16.gmra.mrb[52].mxu0 %vm537_vm0, %v2078_v4 }
 0x31f   : > { %v2080_v5 = vpack.c.bf16 %v2062_v6, %v2061_v16  ;;  %v2060_v59 = vmul.f32 %v4168_v7, %v5261_v9 }
 0x321   : > { %v2079_v61 = vpack.c.bf16 %v2060_v59, %v2059_v36 }
 0x323   : > { %v4170_v44 = vpop.eup %4169  ;;  %3751 = vmatprep.mubr.msk.bf16.mxu0 %vm537_vm0, %v2079_v61 }
 0x324   : > { %v4172_v41 = vpop.eup %4171  ;;  %v2065_v24 = vmul.f32 %v4170_v44, %v5268_v15  ;;  %v5315_v15 = vld [vmem:[%s5918_s7] ss:$0 sm:$0xff] }
 0x325   : > { %v4174_v56 = vpop.eup %4173  ;;  %v2063_v39 = vmul.f32 %v4172_v41, %v5272_v50 }
 0x326   : > { %v4176_v48 = vpop.eup %4175  ;;  %v2066_v2 = vmul.f32 %v4174_v56, %v5277_v13  ;;  %3752 = vmatmul.mubr.msk.bf16.gmra.mrb[56].mxu0 %vm537_vm0, %v2080_v5 }
 0x327   : > { %v2064_v49 = vmul.f32 %v4176_v48, %v5281_v0 }
 0x328   : > { %v2082_v1 = vpack.c.bf16 %v2066_v2, %v2065_v24 }
 0x329   : > { %v2081_v9 = vpack.c.bf16 %v2064_v49, %v2063_v39 }
 0x32b   : > { %3755 = vmatprep.mubr.msk.bf16.mxu0 %vm537_vm0, %v2081_v9 }
 0x32e   : > { %3756 = vmatmul.mubr.msk.bf16.gmra.mrb[60].mxu0 %vm537_vm0, %v2082_v1 }
 0x3c0   : > { %v3729_v13 = vpop.f32.mrb[32].mxu0 }
 0x3c1   : > { %v2197_v50 = vadd.f32 %v3729_v13, %v5315_v15  ;;  %v2188_v57 = vpop.f32.mrb[33].mxu0 }
 0x3c2   : > { %v2189_v0 = vadd.f32 %v5315_v15, %v2188_v57  ;;  %v3730_v3 = vpop.f32.mrb[34].mxu0 }
 0x3c3   : > { %2669 = vst.msk [vmem:[%s5320_s18 + $0x10] sm:$0xff] %vm1326_vm2, %v2197_v50  ;;  %v2200_v63 = vadd.f32 %v3730_v3, %v5315_v15  ;;  %2351 = vrot.lane.b32.xlu0 %v2197_v50, %s4331_s30  ;;  %v2191_v20 = vpop.f32.mrb[35].mxu0 }
 0x3c4   : > { %2667 = vst.msk [vmem:[%s5320_s18] sm:$0xff] %vm1326_vm2, %v2189_v0  ;;  %v2192_v22 = vadd.f32 %v5315_v15, %v2191_v20 }
 0x3c5   : > { %2670 = vst.msk [vmem:[%s5320_s18 + $0x18] sm:$0xff] %vm1326_vm2, %v2200_v63  ;;  %2353 = vrot.lane.b32.xlu1 %v2200_v63, %s4331_s30 }
 0x3c6   : > { %2668 = vst.msk [vmem:[%s5320_s18 + $0x8] sm:$0xff] %vm1326_vm2, %v2192_v22 }
 0x3c7   : > { %2479 = vrot.lane.b32.xlu0 %v2197_v50, %s4332_s19 }
 0x3c9   : > { %2481 = vrot.lane.b32.xlu1 %v2200_v63, %s4332_s19  ;;  %v3733_v55 = vpop.f32.mrb[36].mxu0 }
 0x3ca   : > { %v2213_v28 = vadd.f32 %v3733_v55, %v5315_v15  ;;  %v2204_v17 = vpop.f32.mrb[37].mxu0 }
 0x3cb   : > { %v2205_v54 = vadd.f32 %v5315_v15, %v2204_v17  ;;  %2347 = vrot.lane.b32.xlu0 %v2189_v0, %s4331_s30  ;;  %v3734_v47 = vpop.f32.mrb[38].mxu0 }
 0x3cc   : > { %2673 = vst.msk [vmem:[%s5320_s18 + $0x30] sm:$0xff] %vm1326_vm2, %v2213_v28  ;;  %v2216_v14 = vadd.f32 %v3734_v47, %v5315_v15  ;;  %v2207_v62 = vpop.f32.mrb[39].mxu0 }
 0x3cd   : > { %2671 = vst.msk [vmem:[%s5320_s18 + $0x20] sm:$0xff] %vm1326_vm2, %v2205_v54  ;;  %v2208_v32 = vadd.f32 %v5315_v15, %v2207_v62  ;;  %2349 = vrot.lane.b32.xlu1 %v2192_v22, %s4331_s30 }
 0x3ce   : > { %2674 = vst.msk [vmem:[%s5320_s18 + $0x38] sm:$0xff] %vm1326_vm2, %v2216_v14 }
 0x3cf   : > { %2672 = vst.msk [vmem:[%s5320_s18 + $0x28] sm:$0xff] %vm1326_vm2, %v2208_v32  ;;  %2475 = vrot.lane.b32.xlu0 %v2189_v0, %s4332_s19 }
 0x3d1   : > { %2477 = vrot.lane.b32.xlu1 %v2192_v22, %s4332_s19  ;;  %v3737_v25 = vpop.f32.mrb[40].mxu0 }
 0x3d2   : > { %v2229_v10 = vadd.f32 %v3737_v25, %v5315_v15  ;;  %v2220_v11 = vpop.f32.mrb[41].mxu0 }
 0x3d3   : > { %v2221_v52 = vadd.f32 %v5315_v15, %v2220_v11  ;;  %2359 = vrot.lane.b32.xlu0 %v2213_v28, %s4331_s30  ;;  %v3738_v4 = vpop.f32.mrb[42].mxu0 }
 0x3d4   : > { %2677 = vst.msk [vmem:[%s5320_s18 + $0x50] sm:$0xff] %vm1326_vm2, %v2229_v10  ;;  %v2232_v58 = vadd.f32 %v3738_v4, %v5315_v15  ;;  %v2223_v60 = vpop.f32.mrb[43].mxu0 }
 0x3d5   : > { %2675 = vst.msk [vmem:[%s5320_s18 + $0x40] sm:$0xff] %vm1326_vm2, %v2221_v52  ;;  %v2224_v8 = vadd.f32 %v5315_v15, %v2223_v60  ;;  %2361 = vrot.lane.b32.xlu1 %v2216_v14, %s4331_s30 }
 0x3d6   : > { %2678 = vst.msk [vmem:[%s5320_s18 + $0x58] sm:$0xff] %vm1326_vm2, %v2232_v58 }
 0x3d7   : > { %2676 = vst.msk [vmem:[%s5320_s18 + $0x48] sm:$0xff] %vm1326_vm2, %v2224_v8  ;;  %2487 = vrot.lane.b32.xlu0 %v2213_v28, %s4332_s19 }
 0x3d9   : > { %2489 = vrot.lane.b32.xlu1 %v2216_v14, %s4332_s19 }
 0x3da   : > { %v3741_v53 = vpop.f32.mrb[44].mxu0 }
 0x3db   : > { %v2245_v33 = vadd.f32 %v3741_v53, %v5315_v15  ;;  %v2236_v46 = vpop.f32.mrb[45].mxu0  ;;  %2355 = vrot.lane.b32.xlu0 %v2205_v54, %s4331_s30 }
 0x3dc   : > { %v2237_v40 = vadd.f32 %v5315_v15, %v2236_v46  ;;  %v3742_v12 = vpop.f32.mrb[46].mxu0 }
 0x3dd   : > { %2681 = vst.msk [vmem:[%s5320_s18 + $0x70] sm:$0xff] %vm1326_vm2, %v2245_v33  ;;  %v2248_v51 = vadd.f32 %v3742_v12, %v5315_v15  ;;  %v2239_v31 = vpop.f32.mrb[47].mxu0  ;;  %2357 = vrot.lane.b32.xlu1 %v2208_v32, %s4331_s30 }
 0x3de   : > { %2679 = vst.msk [vmem:[%s5320_s18 + $0x60] sm:$0xff] %vm1326_vm2, %v2237_v40  ;;  %v2240_v16 = vadd.f32 %v5315_v15, %v2239_v31 }
 0x3df   : > { %2682 = vst.msk [vmem:[%s5320_s18 + $0x78] sm:$0xff] %vm1326_vm2, %v2248_v51  ;;  %2483 = vrot.lane.b32.xlu0 %v2205_v54, %s4332_s19 }
 0x3e0   : > { %2680 = vst.msk [vmem:[%s5320_s18 + $0x68] sm:$0xff] %vm1326_vm2, %v2240_v16 }
 0x3e1   : > { %2485 = vrot.lane.b32.xlu1 %v2208_v32, %s4332_s19 }
 0x3e3   : > { %2367 = vrot.lane.b32.xlu0 %v2229_v10, %s4331_s30 }
 0x3e5   : > { %2369 = vrot.lane.b32.xlu1 %v2232_v58, %s4331_s30 }
 0x3e7   : > { %2495 = vrot.lane.b32.xlu0 %v2229_v10, %s4332_s19 }
 0x3e9   : > { %v3745_v6 = vpop.f32.mrb[48].mxu0  ;;  %2497 = vrot.lane.b32.xlu1 %v2232_v58, %s4332_s19 }
 0x3ea   : > { %v2261_v7 = vadd.f32 %v3745_v6, %v5315_v15  ;;  %v2252_v36 = vpop.f32.mrb[49].mxu0 }
 0x3eb   : > { %v2253_v5 = vadd.f32 %v5315_v15, %v2252_v36  ;;  %v3746_v59 = vpop.f32.mrb[50].mxu0  ;;  %2363 = vrot.lane.b32.xlu0 %v2221_v52, %s4331_s30 }
 0x3ec   : > { %2685 = vst.msk [vmem:[%s5320_s18 + $0x90] sm:$0xff] %vm1326_vm2, %v2261_v7  ;;  %v2264_v61 = vadd.f32 %v3746_v59, %v5315_v15  ;;  %v2255_v44 = vpop.f32.mrb[51].mxu0 }
 0x3ed   : > { %2683 = vst.msk [vmem:[%s5320_s18 + $0x80] sm:$0xff] %vm1326_vm2, %v2253_v5  ;;  %v2256_v41 = vadd.f32 %v5315_v15, %v2255_v44  ;;  %2365 = vrot.lane.b32.xlu1 %v2224_v8, %s4331_s30 }
 0x3ee   : > { %2686 = vst.msk [vmem:[%s5320_s18 + $0x98] sm:$0xff] %vm1326_vm2, %v2264_v61 }
 0x3ef   : > { %2684 = vst.msk [vmem:[%s5320_s18 + $0x88] sm:$0xff] %vm1326_vm2, %v2256_v41  ;;  %2491 = vrot.lane.b32.xlu0 %v2221_v52, %s4332_s19 }
 0x3f1   : > { %v3749_v56 = vpop.f32.mrb[52].mxu0  ;;  %2493 = vrot.lane.b32.xlu1 %v2224_v8, %s4332_s19 }
 0x3f2   : > { %v2277_v48 = vadd.f32 %v3749_v56, %v5315_v15  ;;  %v2268_v24 = vpop.f32.mrb[53].mxu0 }
 0x3f3   : > { %v2269_v2 = vadd.f32 %v5315_v15, %v2268_v24  ;;  %v3750_v39 = vpop.f32.mrb[54].mxu0  ;;  %2375 = vrot.lane.b32.xlu0 %v2245_v33, %s4331_s30 }
 0x3f4   : > { %2689 = vst.msk [vmem:[%s5320_s18 + $0xb0] sm:$0xff] %vm1326_vm2, %v2277_v48  ;;  %v2280_v49 = vadd.f32 %v3750_v39, %v5315_v15  ;;  %v2271_v1 = vpop.f32.mrb[55].mxu0 }
 0x3f5   : > { %2687 = vst.msk [vmem:[%s5320_s18 + $0xa0] sm:$0xff] %vm1326_vm2, %v2269_v2  ;;  %v2272_v9 = vadd.f32 %v5315_v15, %v2271_v1  ;;  %2377 = vrot.lane.b32.xlu1 %v2248_v51, %s4331_s30 }
 0x3f6   : > { %2690 = vst.msk [vmem:[%s5320_s18 + $0xb8] sm:$0xff] %vm1326_vm2, %v2280_v49 }
 0x3f7   : > { %2688 = vst.msk [vmem:[%s5320_s18 + $0xa8] sm:$0xff] %vm1326_vm2, %v2272_v9  ;;  %2503 = vrot.lane.b32.xlu0 %v2245_v33, %s4332_s19 }
 0x3f9   : > { %v3753_v13 = vpop.f32.mrb[56].mxu0  ;;  %2505 = vrot.lane.b32.xlu1 %v2248_v51, %s4332_s19 }
 0x3fa   : > { %v2293_v50 = vadd.f32 %v3753_v13, %v5315_v15  ;;  %v2284_v57 = vpop.f32.mrb[57].mxu0 }
 0x3fb   : > { %v2285_v0 = vadd.f32 %v5315_v15, %v2284_v57  ;;  %v3754_v3 = vpop.f32.mrb[58].mxu0  ;;  %2371 = vrot.lane.b32.xlu0 %v2237_v40, %s4331_s30 }
 0x3fc   : > { %2693 = vst.msk [vmem:[%s5320_s18 + $0xd0] sm:$0xff] %vm1326_vm2, %v2293_v50  ;;  %v2296_v63 = vadd.f32 %v3754_v3, %v5315_v15  ;;  %v2287_v20 = vpop.f32.mrb[59].mxu0 }
 0x3fd   : > { %2691 = vst.msk [vmem:[%s5320_s18 + $0xc0] sm:$0xff] %vm1326_vm2, %v2285_v0  ;;  %v2288_v22 = vadd.f32 %v5315_v15, %v2287_v20  ;;  %2373 = vrot.lane.b32.xlu1 %v2240_v16, %s4331_s30 }
 0x3fe   : > { %2694 = vst.msk [vmem:[%s5320_s18 + $0xd8] sm:$0xff] %vm1326_vm2, %v2296_v63 }
 0x3ff   : > { %2692 = vst.msk [vmem:[%s5320_s18 + $0xc8] sm:$0xff] %vm1326_vm2, %v2288_v22  ;;  %2499 = vrot.lane.b32.xlu0 %v2237_v40, %s4332_s19 }
 0x401   : > { %v3757_v55 = vpop.f32.mrb[60].mxu0  ;;  %2501 = vrot.lane.b32.xlu1 %v2240_v16, %s4332_s19 }
 0x402   : > { %v2309_v28 = vadd.f32 %v3757_v55, %v5315_v15  ;;  %v2300_v17 = vpop.f32.mrb[61].mxu0 }
 0x403   : > { %v2301_v54 = vadd.f32 %v5315_v15, %v2300_v17  ;;  %v3758_v47 = vpop.f32.mrb[62].mxu0  ;;  %2383 = vrot.lane.b32.xlu0 %v2261_v7, %s4331_s30 }
 0x404   : > { %2697 = vst.msk [vmem:[%s5320_s18 + $0xf0] sm:$0xff] %vm1326_vm2, %v2309_v28  ;;  %v2312_v14 = vadd.f32 %v3758_v47, %v5315_v15  ;;  %v2303_v62 = vpop.f32.mrb[63].mxu0 }
 0x405   : > { %2695 = vst.msk [vmem:[%s5320_s18 + $0xe0] sm:$0xff] %vm1326_vm2, %v2301_v54  ;;  %v2304_v32 = vadd.f32 %v5315_v15, %v2303_v62  ;;  %2385 = vrot.lane.b32.xlu1 %v2264_v61, %s4331_s30 }
 0x406   : > { %2698 = vst.msk [vmem:[%s5320_s18 + $0xf8] sm:$0xff] %vm1326_vm2, %v2312_v14 }
 0x407   : > { %2696 = vst.msk [vmem:[%s5320_s18 + $0xe8] sm:$0xff] %vm1326_vm2, %v2304_v32  ;;  %2511 = vrot.lane.b32.xlu0 %v2261_v7, %s4332_s19 }
 0x409   : > { %2513 = vrot.lane.b32.xlu1 %v2264_v61, %s4332_s19 }
 0x40b   : > { %2379 = vrot.lane.b32.xlu0 %v2253_v5, %s4331_s30 }
 0x40d   : > { %2381 = vrot.lane.b32.xlu1 %v2256_v41, %s4331_s30 }
 0x40f   : > { %2507 = vrot.lane.b32.xlu0 %v2253_v5, %s4332_s19 }
 0x411   : > { %2509 = vrot.lane.b32.xlu1 %v2256_v41, %s4332_s19 }
 0x413   : > { %2391 = vrot.lane.b32.xlu0 %v2277_v48, %s4331_s30 }
 0x415   : > { %2393 = vrot.lane.b32.xlu1 %v2280_v49, %s4331_s30 }
 0x417   : > { %2519 = vrot.lane.b32.xlu0 %v2277_v48, %s4332_s19 }
 0x419   : > { %2521 = vrot.lane.b32.xlu1 %v2280_v49, %s4332_s19 }
 0x41b   : > { %2387 = vrot.lane.b32.xlu0 %v2269_v2, %s4331_s30 }
 0x41d   : > { %2389 = vrot.lane.b32.xlu1 %v2272_v9, %s4331_s30 }
 0x41f   : > { %2515 = vrot.lane.b32.xlu0 %v2269_v2, %s4332_s19 }
 0x421   : > { %2517 = vrot.lane.b32.xlu1 %v2272_v9, %s4332_s19 }
 0x423   : > { %2399 = vrot.lane.b32.xlu0 %v2293_v50, %s4331_s30 }
 0x425   : > { %2401 = vrot.lane.b32.xlu1 %v2296_v63, %s4331_s30 }
 0x427   : > { %2527 = vrot.lane.b32.xlu0 %v2293_v50, %s4332_s19 }
 0x429   : > { %2529 = vrot.lane.b32.xlu1 %v2296_v63, %s4332_s19 }
 0x42b   : > { %2395 = vrot.lane.b32.xlu0 %v2285_v0, %s4331_s30 }
 0x42d   : > { %2397 = vrot.lane.b32.xlu1 %v2288_v22, %s4331_s30 }
 0x42f   : > { %2523 = vrot.lane.b32.xlu0 %v2285_v0, %s4332_s19 }
 0x431   : > { %2525 = vrot.lane.b32.xlu1 %v2288_v22, %s4332_s19 }
 0x433   : > { %2407 = vrot.lane.b32.xlu0 %v2309_v28, %s4331_s30 }
 0x435   : > { %v2352_v15 = vpop.permute.xlu0 %2351  ;;  %2409 = vrot.lane.b32.xlu1 %v2312_v14, %s4331_s30 }
 0x436   : > { %v2445_v11 = vmul.f32 %v4465_v18, %v2352_v15 }
 0x437   : > { %2403 = vrot.lane.b32.xlu0 %v2301_v54, %s4331_s30  ;;  %v2354_v25 = vpop.permute.xlu1 %2353 }
 0x438   : > { %v2446_v58 = vmul.f32 %v4473_v21, %v2354_v25 }
 0x439   : > { %v2480_v10 = vpop.permute.xlu0 %2479  ;;  %2405 = vrot.lane.b32.xlu1 %v2304_v32, %s4331_s30 }
 0x43a   : > { %v2573_v52 = vmul.f32 %v4465_v18, %v2480_v10 }
 0x43b   : > { %2531 = vrot.lane.b32.xlu0 %v2301_v54, %s4332_s19  ;;  %v2482_v4 = vpop.permute.xlu1 %2481 }
 0x43c   : > { %v2605_v60 = vsel %vm1594_vm11, %v2445_v11, %v2573_v52  ;;  %v2574_v8 = vmul.f32 %v4473_v21, %v2482_v4 }
 0x43d   : > { %2637 = vst.msk [vmem:[%s5483_s21 + $0x10] sm:$0xff] %vm537_vm0, %v2605_v60  ;;  %v2348_v53 = vpop.permute.xlu0 %2347  ;;  %2533 = vrot.lane.b32.xlu1 %v2304_v32, %s4332_s19 }
 0x43e   : > { %v2606_v18 = vsel %vm1594_vm11, %v2446_v58, %v2574_v8  ;;  %v2443_v21 = vmul.f32 %v2348_v53, %v4467_v19 }
 0x43f   : > { %2638 = vst.msk [vmem:[%s5483_s21 + $0x18] sm:$0xff] %vm537_vm0, %v2606_v18  ;;  %2535 = vrot.lane.b32.xlu0 %v2309_v28, %s4332_s19  ;;  %v2350_v33 = vpop.permute.xlu1 %2349 }
 0x440   : > { %v2444_v51 = vmul.f32 %v2350_v33, %v4481_v23 }
 0x441   : > { %v2476_v46 = vpop.permute.xlu0 %2475  ;;  %2537 = vrot.lane.b32.xlu1 %v2312_v14, %s4332_s19 }
 0x442   : > { %v2571_v40 = vmul.f32 %v2476_v46, %v4467_v19 }
 0x443   : > { %v2478_v12 = vpop.permute.xlu1 %2477 }
 0x444   : > { %v2603_v31 = vsel %vm1594_vm11, %v2443_v21, %v2571_v40  ;;  %v2572_v16 = vmul.f32 %v2478_v12, %v4481_v23  ;;  %v5977_v40 = vld [vmem:[#allocation4_spill] sm:$0xff] }
 0x445   : > { %2635 = vst.msk [vmem:[%s5483_s21] sm:$0xff] %vm537_vm0, %v2603_v31  ;;  %v2360_v6 = vpop.permute.xlu0 %2359 }
 0x446   : > { %v2604_v7 = vsel %vm1594_vm11, %v2444_v51, %v2572_v16  ;;  %v2449_v19 = vmul.f32 %v4497_v26, %v2360_v6 }
 0x447   : > { %2636 = vst.msk [vmem:[%s5483_s21 + $0x8] sm:$0xff] %vm537_vm0, %v2604_v7  ;;  %v2362_v36 = vpop.permute.xlu1 %2361 }
 0x448   : > { %v2450_v44 = vmul.f32 %v4505_v29, %v2362_v36  ;;  %v5978_v36 = vld [vmem:[#allocation5_spill] sm:$0xff] }
 0x449   : > { %v2488_v5 = vpop.permute.xlu0 %2487 }
 0x44a   : > { %v2577_v59 = vmul.f32 %v4497_v26, %v2488_v5 }
 0x44b   : > { %v2490_v61 = vpop.permute.xlu1 %2489 }
 0x44c   : > { %v2609_v23 = vsel %vm1594_vm11, %v2449_v19, %v2577_v59  ;;  %v2578_v41 = vmul.f32 %v4505_v29, %v2490_v61  ;;  %v5979_v59 = vld [vmem:[#allocation7_spill] sm:$0xff] }
 0x44d   : > { %2641 = vst.msk [vmem:[%s5483_s21 + $0x30] sm:$0xff] %vm537_vm0, %v2609_v23  ;;  %v2356_v56 = vpop.permute.xlu0 %2355 }
 0x44e   : > { %v2610_v48 = vsel %vm1594_vm11, %v2450_v44, %v2578_v41  ;;  %v2447_v26 = vmul.f32 %v2356_v56, %v4499_v27 }
 0x44f   : > { %2642 = vst.msk [vmem:[%s5483_s21 + $0x38] sm:$0xff] %vm537_vm0, %v2610_v48  ;;  %v2358_v24 = vpop.permute.xlu1 %2357 }
 0x450   : > { %v2448_v1 = vmul.f32 %v2358_v24, %v4507_v30 }
 0x451   : > { %v2484_v2 = vpop.permute.xlu0 %2483 }
 0x452   : > { %v2575_v39 = vmul.f32 %v2484_v2, %v4499_v27  ;;  %v5980_v2 = vld [vmem:[#allocation6_spill] sm:$0xff] }
 0x453   : > { %v2486_v49 = vpop.permute.xlu1 %2485 }
 0x454   : > { %v2607_v29 = vsel %vm1594_vm11, %v2447_v26, %v2575_v39  ;;  %v2576_v9 = vmul.f32 %v2486_v49, %v4507_v30 }
 0x455   : > { %2639 = vst.msk [vmem:[%s5483_s21 + $0x20] sm:$0xff] %vm537_vm0, %v2607_v29  ;;  %v2368_v13 = vpop.permute.xlu0 %2367 }
 0x456   : > { %v2608_v50 = vsel %vm1594_vm11, %v2448_v1, %v2576_v9  ;;  %v2453_v27 = vmul.f32 %v4527_v34, %v2368_v13  ;;  %v5981_v1 = vld [vmem:[#allocation8_spill] sm:$0xff] }
 0x457   : > { %2640 = vst.msk [vmem:[%s5483_s21 + $0x28] sm:$0xff] %vm537_vm0, %v2608_v50  ;;  %v2370_v57 = vpop.permute.xlu1 %2369 }
 0x458   : > { %v2454_v20 = vmul.f32 %v4537_v37, %v2370_v57 }
 0x459   : > { %v2496_v0 = vpop.permute.xlu0 %2495 }
 0x45a   : > { %v2581_v3 = vmul.f32 %v4527_v34, %v2496_v0 }
 0x45b   : > { %v2498_v63 = vpop.permute.xlu1 %2497 }
 0x45c   : > { %v2613_v30 = vsel %vm1594_vm11, %v2453_v27, %v2581_v3  ;;  %v2582_v22 = vmul.f32 %v4537_v37, %v2498_v63  ;;  %v5982_v3 = vld [vmem:[#allocation9_spill] sm:$0xff] }
 0x45d   : > { %2645 = vst.msk [vmem:[%s5483_s21 + $0x50] sm:$0xff] %vm537_vm0, %v2613_v30  ;;  %v2364_v55 = vpop.permute.xlu0 %2363 }
 0x45e   : > { %v2614_v28 = vsel %vm1594_vm11, %v2454_v20, %v2582_v22  ;;  %v2451_v34 = vmul.f32 %v2364_v55, %v4529_v35  ;;  %v5983_v22 = vld [vmem:[#allocation11_spill] sm:$0xff] }
 0x45f   : > { %2646 = vst.msk [vmem:[%s5483_s21 + $0x58] sm:$0xff] %vm537_vm0, %v2614_v28  ;;  %v2366_v17 = vpop.permute.xlu1 %2365 }
 0x460   : > { %v2452_v62 = vmul.f32 %v2366_v17, %v4539_v38 }
 0x461   : > { %v2492_v54 = vpop.permute.xlu0 %2491 }
 0x462   : > { %v2579_v47 = vmul.f32 %v2492_v54, %v4529_v35 }
 0x463   : > { %v2494_v14 = vpop.permute.xlu1 %2493 }
 0x464   : > { %v2611_v37 = vsel %vm1594_vm11, %v2451_v34, %v2579_v47  ;;  %v2580_v32 = vmul.f32 %v2494_v14, %v4539_v38 }
 0x465   : > { %2643 = vst.msk [vmem:[%s5483_s21 + $0x40] sm:$0xff] %vm537_vm0, %v2611_v37  ;;  %v2376_v15 = vpop.permute.xlu0 %2375 }
 0x466   : > { %v2612_v25 = vsel %vm1594_vm11, %v2452_v62, %v2580_v32  ;;  %v2457_v35 = vmul.f32 %v4559_v42, %v2376_v15  ;;  %v5984_v62 = vld [vmem:[#allocation10_spill] sm:$0xff] }
 0x467   : > { %2644 = vst.msk [vmem:[%s5483_s21 + $0x48] sm:$0xff] %vm537_vm0, %v2612_v25  ;;  %v2378_v10 = vpop.permute.xlu1 %2377  ;;  %v5985_v25 = vld [vmem:[#allocation12_spill] sm:$0xff] }
 0x468   : > { %v2458_v58 = vmul.f32 %v4569_v45, %v2378_v10 }
 0x469   : > { %v2504_v11 = vpop.permute.xlu0 %2503 }
 0x46a   : > { %v2585_v52 = vmul.f32 %v4559_v42, %v2504_v11 }
 0x46b   : > { %v2506_v4 = vpop.permute.xlu1 %2505 }
 0x46c   : > { %v2617_v38 = vsel %vm1594_vm11, %v2457_v35, %v2585_v52  ;;  %v2586_v60 = vmul.f32 %v4569_v45, %v2506_v4 }
 0x46d   : > { %2649 = vst.msk [vmem:[%s5483_s21 + $0x70] sm:$0xff] %vm537_vm0, %v2617_v38  ;;  %v2372_v8 = vpop.permute.xlu0 %2371 }
 0x46e   : > { %v2618_v53 = vsel %vm1594_vm11, %v2458_v58, %v2586_v60  ;;  %v2455_v42 = vmul.f32 %v2372_v8, %v4561_v43  ;;  %v5986_v60 = vld [vmem:[#allocation13_spill] sm:$0xff] }
 0x46f   : > { %2650 = vst.msk [vmem:[%s5483_s21 + $0x78] sm:$0xff] %vm537_vm0, %v2618_v53  ;;  %v2374_v18 = vpop.permute.xlu1 %2373 }
 0x470   : > { %v2456_v12 = vmul.f32 %v2374_v18, %v5977_v40 }
 0x471   : > { %v2500_v33 = vpop.permute.xlu0 %2499 }
 0x472   : > { %v2583_v46 = vmul.f32 %v2500_v33, %v4561_v43  ;;  %v5987_v33 = vld [vmem:[#allocation15_spill] sm:$0xff] }
 0x473   : > { %v2502_v21 = vpop.permute.xlu1 %2501 }
 0x474   : > { %v2615_v45 = vsel %vm1594_vm11, %v2455_v42, %v2583_v46  ;;  %v2584_v51 = vmul.f32 %v2502_v21, %v5977_v40 }
 0x475   : > { %2647 = vst.msk [vmem:[%s5483_s21 + $0x60] sm:$0xff] %vm537_vm0, %v2615_v45  ;;  %v2384_v31 = vpop.permute.xlu0 %2383 }
 0x476   : > { %v2616_v16 = vsel %vm1594_vm11, %v2456_v12, %v2584_v51  ;;  %v2461_v43 = vmul.f32 %v5978_v36, %v2384_v31  ;;  %v5988_v31 = vld [vmem:[#allocation14_spill] sm:$0xff] }
 0x477   : > { %2648 = vst.msk [vmem:[%s5483_s21 + $0x68] sm:$0xff] %vm537_vm0, %v2616_v16  ;;  %v2386_v6 = vpop.permute.xlu1 %2385 }
 0x478   : > { %v2462_v61 = vmul.f32 %v5979_v59, %v2386_v6 }
 0x479   : > { %v2512_v7 = vpop.permute.xlu0 %2511 }
 0x47a   : > { %v2589_v5 = vmul.f32 %v5978_v36, %v2512_v7  ;;  %v5989_v36 = vld [vmem:[#allocation16_spill] sm:$0xff] }
 0x47b   : > { %v2514_v19 = vpop.permute.xlu1 %2513 }
 0x47c   : > { %v2621_v44 = vsel %vm1594_vm11, %v2461_v43, %v2589_v5  ;;  %v2590_v23 = vmul.f32 %v5979_v59, %v2514_v19 }
 0x47d   : > { %2653 = vst.msk [vmem:[%s5483_s21 + $0x90] sm:$0xff] %vm537_vm0, %v2621_v44  ;;  %v2380_v41 = vpop.permute.xlu0 %2379 }
 0x47e   : > { %v2622_v56 = vsel %vm1594_vm11, %v2462_v61, %v2590_v23  ;;  %v2459_v26 = vmul.f32 %v2380_v41, %v5980_v2 }
 0x47f   : > { %2654 = vst.msk [vmem:[%s5483_s21 + $0x98] sm:$0xff] %vm537_vm0, %v2622_v56  ;;  %v2382_v48 = vpop.permute.xlu1 %2381 }
 0x480   : > { %v2460_v29 = vmul.f32 %v2382_v48, %v5981_v1  ;;  %v5990_v48 = vld [vmem:[#allocation18_spill] sm:$0xff] }
 0x481   : > { %v2508_v24 = vpop.permute.xlu0 %2507 }
 0x482   : > { %v2587_v39 = vmul.f32 %v2508_v24, %v5980_v2 }
 0x483   : > { %v2510_v49 = vpop.permute.xlu1 %2509 }
 0x484   : > { %v2619_v9 = vsel %vm1594_vm11, %v2459_v26, %v2587_v39  ;;  %v2588_v13 = vmul.f32 %v2510_v49, %v5981_v1  ;;  %v5991_v39 = vld [vmem:[#allocation20_spill] sm:$0xff] }
 0x485   : > { %2651 = vst.msk [vmem:[%s5483_s21 + $0x80] sm:$0xff] %vm537_vm0, %v2619_v9  ;;  %v2392_v50 = vpop.permute.xlu0 %2391 }
 0x486   : > { %v2620_v57 = vsel %vm1594_vm11, %v2460_v29, %v2588_v13  ;;  %v2465_v63 = vmul.f32 %v5982_v3, %v2392_v50  ;;  %v5992_v13 = vld [vmem:[#allocation17_spill] sm:$0xff] }
 0x487   : > { %2652 = vst.msk [vmem:[%s5483_s21 + $0x88] sm:$0xff] %vm537_vm0, %v2620_v57  ;;  %v2394_v0 = vpop.permute.xlu1 %2393 }
 0x488   : > { %v2466_v55 = vmul.f32 %v5983_v22, %v2394_v0 }
 0x489   : > { %v2520_v27 = vpop.permute.xlu0 %2519 }
 0x48a   : > { %v2593_v20 = vmul.f32 %v5982_v3, %v2520_v27  ;;  %v5993_v3 = vld [vmem:[#allocation19_spill] sm:$0xff] }
 0x48b   : > { %v2522_v30 = vpop.permute.xlu1 %2521 }
 0x48c   : > { %v2625_v28 = vsel %vm1594_vm11, %v2465_v63, %v2593_v20  ;;  %v2594_v17 = vmul.f32 %v5983_v22, %v2522_v30 }
 0x48d   : > { %2657 = vst.msk [vmem:[%s5483_s21 + $0xb0] sm:$0xff] %vm537_vm0, %v2625_v28  ;;  %v2388_v54 = vpop.permute.xlu0 %2387 }
 0x48e   : > { %v2626_v34 = vsel %vm1594_vm11, %v2466_v55, %v2594_v17  ;;  %v2463_v37 = vmul.f32 %v2388_v54, %v5984_v62 }
 0x48f   : > { %2658 = vst.msk [vmem:[%s5483_s21 + $0xb8] sm:$0xff] %vm537_vm0, %v2626_v34  ;;  %v2390_v47 = vpop.permute.xlu1 %2389 }
 0x490   : > { %v2464_v10 = vmul.f32 %v2390_v47, %v5985_v25 }
 0x491   : > { %v2516_v14 = vpop.permute.xlu0 %2515 }
 0x492   : > { %v2591_v32 = vmul.f32 %v2516_v14, %v5984_v62 }
 0x493   : > { %v2518_v15 = vpop.permute.xlu1 %2517 }
 0x494   : > { %v2623_v11 = vsel %vm1594_vm11, %v2463_v37, %v2591_v32  ;;  %v2592_v35 = vmul.f32 %v2518_v15, %v5985_v25 }
 0x495   : > { %2655 = vst.msk [vmem:[%s5483_s21 + $0xa0] sm:$0xff] %vm537_vm0, %v2623_v11  ;;  %v2400_v52 = vpop.permute.xlu0 %2399 }
 0x496   : > { %v2624_v4 = vsel %vm1594_vm11, %v2464_v10, %v2592_v35  ;;  %v2469_v8 = vmul.f32 %v5986_v60, %v2400_v52 }
 0x497   : > { %2656 = vst.msk [vmem:[%s5483_s21 + $0xa8] sm:$0xff] %vm537_vm0, %v2624_v4  ;;  %v2402_v58 = vpop.permute.xlu1 %2401 }
 0x498   : > { %v2470_v42 = vmul.f32 %v5987_v33, %v2402_v58 }
 0x499   : > { %v2528_v38 = vpop.permute.xlu0 %2527 }
 0x49a   : > { %v2597_v53 = vmul.f32 %v5986_v60, %v2528_v38 }
 0x49b   : > { %v2530_v18 = vpop.permute.xlu1 %2529 }
 0x49c   : > { %v2629_v46 = vsel %vm1594_vm11, %v2469_v8, %v2597_v53  ;;  %v2598_v21 = vmul.f32 %v5987_v33, %v2530_v18 }
 0x49d   : > { %2661 = vst.msk [vmem:[%s5483_s21 + $0xd0] sm:$0xff] %vm537_vm0, %v2629_v46  ;;  %v2396_v40 = vpop.permute.xlu0 %2395 }
 0x49e   : > { %v2630_v12 = vsel %vm1594_vm11, %v2470_v42, %v2598_v21  ;;  %v2467_v16 = vmul.f32 %v2396_v40, %v5988_v31 }
 0x49f   : > { %2662 = vst.msk [vmem:[%s5483_s21 + $0xd8] sm:$0xff] %vm537_vm0, %v2630_v12  ;;  %v2398_v45 = vpop.permute.xlu1 %2397 }
 0x4a0   : > { %v2468_v43 = vmul.f32 %v2398_v45, %v5989_v36 }
 0x4a1   : > { %v2524_v51 = vpop.permute.xlu0 %2523 }
 0x4a2   : > { %v2595_v6 = vmul.f32 %v2524_v51, %v5988_v31 }
 0x4a3   : > { %v2526_v7 = vpop.permute.xlu1 %2525 }
 0x4a4   : > { %v2627_v5 = vsel %vm1594_vm11, %v2467_v16, %v2595_v6  ;;  %v2596_v19 = vmul.f32 %v2526_v7, %v5989_v36 }
 0x4a5   : > { %2659 = vst.msk [vmem:[%s5483_s21 + $0xc0] sm:$0xff] %vm537_vm0, %v2627_v5  ;;  %v2408_v59 = vpop.permute.xlu0 %2407 }
 0x4a6   : > { %v2628_v61 = vsel %vm1594_vm11, %v2468_v43, %v2596_v19  ;;  %v2473_v50 = vmul.f32 %v5992_v13, %v2408_v59 }
 0x4a7   : > { %2660 = vst.msk [vmem:[%s5483_s21 + $0xc8] sm:$0xff] %vm537_vm0, %v2628_v61  ;;  %v2410_v44 = vpop.permute.xlu1 %2409 }
 0x4a8   : > { %v2474_v63 = vmul.f32 %v5993_v3, %v2410_v44 }
 0x4a9   : > { %v2404_v23 = vpop.permute.xlu0 %2403 }
 0x4aa   : > { %v2471_v24 = vmul.f32 %v2404_v23, %v5990_v48 }
 0x4ab   : > { %v2406_v41 = vpop.permute.xlu1 %2405 }
 0x4ac   : > { %v2472_v49 = vmul.f32 %v2406_v41, %v5991_v39 }
 0x4ad   : > { %v2532_v56 = vpop.permute.xlu0 %2531 }
 0x4ae   : > { %v2599_v2 = vmul.f32 %v2532_v56, %v5990_v48 }
 0x4af   : > { %v2534_v26 = vpop.permute.xlu1 %2533 }
 0x4b0   : > { %v2631_v1 = vsel %vm1594_vm11, %v2471_v24, %v2599_v2  ;;  %v2600_v29 = vmul.f32 %v2534_v26, %v5991_v39 }
 0x4b1   : > { %2663 = vst.msk [vmem:[%s5483_s21 + $0xe0] sm:$0xff] %vm537_vm0, %v2631_v1  ;;  %v2536_v9 = vpop.permute.xlu0 %2535  ;;  %2709 = sbr.rel (!%p4408_p4) target bundleno = 1264 (0x4f0), region = 56 }
 0x4b2   : > { %v2632_v57 = vsel %vm1594_vm11, %v2472_v49, %v2600_v29  ;;  %v2601_v0 = vmul.f32 %v5992_v13, %v2536_v9 }
 0x4b3   : > { %2664 = vst.msk [vmem:[%s5483_s21 + $0xe8] sm:$0xff] %vm537_vm0, %v2632_v57  ;;  %v2538_v27 = vpop.permute.xlu1 %2537 }
 0x4b4   : > { %v2633_v20 = vsel %vm1594_vm11, %v2473_v50, %v2601_v0  ;;  %v2602_v30 = vmul.f32 %v5993_v3, %v2538_v27 }
 0x4b5   : > { %2665 = vst.msk [vmem:[%s5483_s21 + $0xf0] sm:$0xff] %vm537_vm0, %v2633_v20 }
 0x4b6   : > { %v2634_v22 = vsel %vm1594_vm11, %v2474_v63, %v2602_v30 }
 0x4b7   : > { %2666 = vst.msk [vmem:[%s5483_s21 + $0xf8] sm:$0xff] %vm537_vm0, %v2634_v22 }
 0x4b8   : > { %s6008_s22 = smov (!%p2712_p8, %s2711_s22), 32 }
 0x4b9   : > { %s3514_s27 = sshll.u32 %s6008_s22, 7 }
 0x4ba   : > { %p3517_p9 = scmp.eq.s32.totalorder %s3514_s27, 0 }
 0x4bb   : > { %s5656_s28 = sshrl.u32 (!%p3517_p9), %s6008_s22, 5 }
 0x4bc   : > { %2720 = sbr.rel (%p3517_p9) target bundleno = 1264 (0x4f0), region = 60  ;;  %p3518_p10 = scmp.le.s32.totalorder (!%p3517_p9), %s5656_s28, 0 }
 0x4c3   : > { %3279 = sbr.rel (%p3518_p10) target bundleno = 1243 (0x4db), region = 211  ;;  %s5994_s29 = smov (!%p3518_p10), %s5650_s26 }
 0x4c4   : > { %s5995_s11 = smov (!%p3518_p10), %s5483_s21  ;;  %s5665_s14 = smov (!%p3518_p10), 0  }
 0x4c5   : > { %s5667_s15 = smov (!%p3518_p10), 0  }
 0x4ca LB: >> { %v2844_v55 = vld [vmem:[%s4271_s11] sm:$0xff]  ;;  %v2846_v28 = vld [vmem:[%s4271_s11 + $0x8] sm:$0xff]  ;;  %v2848_v17 = vld [vmem:[%s4271_s11 + $0x10] sm:$0xff]  ;;  %s2908_s30 = sadd.s32 1, %s4275_s14  ;;  %s2838_s15 = sadd.s32 1, %s4279_s15   ;;  %s4279_s15 = sphi %s5667_s15, %s2838_s15   ;;  %s4275_s14 = sphi %s5665_s14, %s5998_s14   ;;  %s4271_s11 = sphi %s5995_s11, %s5997_s11   ;;  %s4267_s29 = sphi %s5994_s29, %s5996_s29  }
 0x4cb   : >> { %2845 = vst [vmem:[%s4267_s29] sm:$0xff] %v2844_v55  ;;  %2847 = vst [vmem:[%s4267_s29 + $0x8] sm:$0xff] %v2846_v28  ;;  %v2850_v54 = vld [vmem:[%s4271_s11 + $0x18] sm:$0xff]  ;;  %v2852_v34 = vld [vmem:[%s4271_s11 + $0x20] sm:$0xff]  ;;  %p2909_p11 = scmp.ge.s32.totalorder %s2908_s30, %s5656_s28  ;;  %p2837_p12 = scmp.ge.s32.totalorder %s2838_s15, %s5656_s28 }
 0x4cc   : >> { %2849 = vst [vmem:[%s4267_s29 + $0x10] sm:$0xff] %v2848_v17  ;;  %v2854_v47 = vld [vmem:[%s4271_s11 + $0x28] sm:$0xff]  ;;  %2851 = vst [vmem:[%s4267_s29 + $0x18] sm:$0xff] %v2850_v54  ;;  %v2856_v14 = vld [vmem:[%s4271_s11 + $0x30] sm:$0xff] }
 0x4cd   : >> { %2853 = vst [vmem:[%s4267_s29 + $0x20] sm:$0xff] %v2852_v34  ;;  %2855 = vst [vmem:[%s4267_s29 + $0x28] sm:$0xff] %v2854_v47  ;;  %v2858_v62 = vld [vmem:[%s4271_s11 + $0x38] sm:$0xff]  ;;  %v2860_v37 = vld [vmem:[%s4271_s11 + $0x40] sm:$0xff]  ;;  %s6010_s30 = smov (%p2909_p11, %s2908_s30), 0 }
 0x4ce   : >> { %2857 = vst [vmem:[%s4267_s29 + $0x30] sm:$0xff] %v2856_v14  ;;  %2859 = vst [vmem:[%s4267_s29 + $0x38] sm:$0xff] %v2858_v62  ;;  %v2862_v32 = vld [vmem:[%s4271_s11 + $0x48] sm:$0xff]  ;;  %v2864_v15 = vld [vmem:[%s4271_s11 + $0x50] sm:$0xff]  ;;  %s3519_s19 = sshll.u32 %s6010_s30, 8  ;;  %s5998_s14 = smov %s6010_s30 }
 0x4cf   : >> { %2861 = vst [vmem:[%s4267_s29 + $0x40] sm:$0xff] %v2860_v37  ;;  %v2866_v25 = vld [vmem:[%s4271_s11 + $0x58] sm:$0xff]  ;;  %2863 = vst [vmem:[%s4267_s29 + $0x48] sm:$0xff] %v2862_v32  ;;  %v2868_v10 = vld [vmem:[%s4271_s11 + $0x60] sm:$0xff]  ;;  %s5723_s23 = scalar_lea.vmem %s5483_s21, %s3519_s19 [#allocation2]   ;;  %s2914_s24 = scalar_lea.vmem %s5650_s26, %s3519_s19  }
 0x4d0   : >> { %2865 = vst [vmem:[%s4267_s29 + $0x50] sm:$0xff] %v2864_v15  ;;  %2867 = vst [vmem:[%s4267_s29 + $0x58] sm:$0xff] %v2866_v25  ;;  %v2870_v11 = vld [vmem:[%s4271_s11 + $0x68] sm:$0xff]  ;;  %v2872_v35 = vld [vmem:[%s4271_s11 + $0x70] sm:$0xff] }
 0x4d1   : >> { %2869 = vst [vmem:[%s4267_s29 + $0x60] sm:$0xff] %v2868_v10  ;;  %2871 = vst [vmem:[%s4267_s29 + $0x68] sm:$0xff] %v2870_v11  ;;  %v2874_v52 = vld [vmem:[%s4271_s11 + $0x78] sm:$0xff]  ;;  %v2876_v4 = vld [vmem:[%s4271_s11 + $0x80] sm:$0xff] }
 0x4d2   : >> { %2873 = vst [vmem:[%s4267_s29 + $0x70] sm:$0xff] %v2872_v35  ;;  %v2878_v58 = vld [vmem:[%s4271_s11 + $0x88] sm:$0xff]  ;;  %2875 = vst [vmem:[%s4267_s29 + $0x78] sm:$0xff] %v2874_v52  ;;  %v2880_v38 = vld [vmem:[%s4271_s11 + $0x90] sm:$0xff] }
 0x4d3   : >> { %2877 = vst [vmem:[%s4267_s29 + $0x80] sm:$0xff] %v2876_v4  ;;  %2879 = vst [vmem:[%s4267_s29 + $0x88] sm:$0xff] %v2878_v58  ;;  %v2882_v60 = vld [vmem:[%s4271_s11 + $0x98] sm:$0xff]  ;;  %v2884_v8 = vld [vmem:[%s4271_s11 + $0xa0] sm:$0xff] }
 0x4d4   : >> { %2881 = vst [vmem:[%s4267_s29 + $0x90] sm:$0xff] %v2880_v38  ;;  %2883 = vst [vmem:[%s4267_s29 + $0x98] sm:$0xff] %v2882_v60  ;;  %v2886_v53 = vld [vmem:[%s4271_s11 + $0xa8] sm:$0xff]  ;;  %v2888_v18 = vld [vmem:[%s4271_s11 + $0xb0] sm:$0xff]  ;;  %2840 = sbr.rel (!%p2837_p12) target bundleno = 1226 (0x4ca), region = 217 }
 0x4d5   : >> { %2885 = vst [vmem:[%s4267_s29 + $0xa0] sm:$0xff] %v2884_v8  ;;  %v2890_v33 = vld [vmem:[%s4271_s11 + $0xb8] sm:$0xff]  ;;  %2887 = vst [vmem:[%s4267_s29 + $0xa8] sm:$0xff] %v2886_v53  ;;  %v2892_v42 = vld [vmem:[%s4271_s11 + $0xc0] sm:$0xff] }
 0x4d6   : >> { %2889 = vst [vmem:[%s4267_s29 + $0xb0] sm:$0xff] %v2888_v18  ;;  %2891 = vst [vmem:[%s4267_s29 + $0xb8] sm:$0xff] %v2890_v33  ;;  %v2894_v46 = vld [vmem:[%s4271_s11 + $0xc8] sm:$0xff]  ;;  %v2896_v21 = vld [vmem:[%s4271_s11 + $0xd0] sm:$0xff] }
 0x4d7   : >> { %2893 = vst [vmem:[%s4267_s29 + $0xc0] sm:$0xff] %v2892_v42  ;;  %2895 = vst [vmem:[%s4267_s29 + $0xc8] sm:$0xff] %v2894_v46  ;;  %v2898_v40 = vld [vmem:[%s4271_s11 + $0xd8] sm:$0xff]  ;;  %v2900_v12 = vld [vmem:[%s4271_s11 + $0xe0] sm:$0xff] }
 0x4d8   : >> { %2897 = vst [vmem:[%s4267_s29 + $0xd0] sm:$0xff] %v2896_v21  ;;  %v2902_v45 = vld [vmem:[%s4271_s11 + $0xe8] sm:$0xff]  ;;  %2899 = vst [vmem:[%s4267_s29 + $0xd8] sm:$0xff] %v2898_v40  ;;  %v2904_v51 = vld [vmem:[%s4271_s11 + $0xf0] sm:$0xff] }
 0x4d9   : >> { %2901 = vst [vmem:[%s4267_s29 + $0xe0] sm:$0xff] %v2900_v12  ;;  %2903 = vst [vmem:[%s4267_s29 + $0xe8] sm:$0xff] %v2902_v45  ;;  %v2906_v31 = vld [vmem:[%s4271_s11 + $0xf8] sm:$0xff]  ;;  %s5997_s11 = smov %s5723_s23 }
 0x4da   : >> { %2905 = vst [vmem:[%s4267_s29 + $0xf0] sm:$0xff] %v2904_v51  ;;  %2907 = vst [vmem:[%s4267_s29 + $0xf8] sm:$0xff] %v2906_v31  ;;  %s5996_s29 = smov %s2914_s24 }
 0x4db PF: > { %s5764_s25 = sand.u32 31, %s6008_s22   ;;  %s3544_s27 = sshll.u32 %s5656_s28, 8 }
 0x4dc   : > { %s2919_s19 = scalar_lea.vmem %s5483_s21, %s3544_s27 [#allocation2]   ;;  %s2921_s0 = scalar_lea.vmem %s5650_s26, %s3544_s27  }
 0x4dd   : > { %p3524_p13 = scmp.le.s32.totalorder %s5764_s25, 0 }
 0x4de   : > { %s4281_s24 = smov (!%p3524_p13), %s2921_s0   ;;  %s4285_s23 = smov (!%p3524_p13), %s2919_s19  }
 0x4df   : > { %3293 = sbr.rel (%p3524_p13) target bundleno = 1264 (0x4f0), region = 222  ;;  %s4289_s1 = smov (!%p3524_p13), 0  }
 0x4e0   : > { %s4293_s30 = smov (!%p3524_p13), 0  }
 0x4e6 LB: >> { %v2931_v16 = vld [vmem:[%s4287_s23] sm:$0xff]  ;;  %s2933_s22 = sadd.s32 1, %s4291_s1  ;;  %s2925_s30 = sadd.s32 1, %s4295_s30   ;;  %s4295_s30 = sphi %s4293_s30, %s2925_s30   ;;  %s4291_s1 = sphi %s4289_s1, %s4290_s1   ;;  %s4287_s23 = sphi %s4285_s23, %s2938_s23   ;;  %s4283_s24 = sphi %s4281_s24, %s2939_s24  }
 0x4e7   : >> { %2932 = vst [vmem:[%s4283_s24] sm:$0xff] %v2931_v16  ;;  %p2934_p0 = scmp.ge.s32.totalorder %s2933_s22, %s5764_s25  ;;  %p2924_p1 = scmp.ge.s32.totalorder %s2925_s30, %s5764_s25 }
 0x4e9   : >> { %s6012_s22 = smov (%p2934_p0, %s2933_s22), 0  ;;  %2927 = sbr.rel (!%p2924_p1) target bundleno = 1254 (0x4e6), region = 228 }
 0x4ea   : >> { %s3525_s21 = sshll.u32 %s6012_s22, 3  ;;  %s4290_s1 = smov %s6012_s22  }
 0x4eb   : >> { %s2938_s23 = scalar_lea.vmem %s2919_s19, %s3525_s21 [#allocation2]   ;;  %s2939_s24 = scalar_lea.vmem %s2921_s0, %s3525_s21  }
 0x4f0 PF: > { %2945 = sbr.rel (!%p4408_p4) target bundleno = 1327 (0x52f), region = 108  ;;  %s2947_s1 = ssub.s32 (%p4408_p4), 63, %s4416_s20 }
 0x4f1   : > { %s3546_s26 = sshll.u32 (%p4408_p4), %s4396_s12, 8  ;;  %p2948_p2 = scmp.lt.s32.totalorder (%p4408_p4), %s2947_s1, 32 }
 0x4f2   : > { %s5779_s11 = scalar_lea.vmem (%p4408_p4), %s5920_s9, %s3546_s26  }
 0x4f7   : > { %s6014_s1 = smov (!%p2948_p2, %s2947_s1), 32 }
 0x4f8   : > { %s3528_s14 = sshll.u32 %s6014_s1, 7 }
 0x4f9   : > { %p3531_p3 = scmp.eq.s32.totalorder %s3528_s14, 0 }
 0x4fa   : > { %s5785_s0 = sshrl.u32 (!%p3531_p3), %s6014_s1, 5 }
 0x4fb   : > { %2956 = sbr.rel (%p3531_p3) target bundleno = 1327 (0x52f), region = 112  ;;  %p3532_p4 = scmp.le.s32.totalorder (!%p3531_p3), %s5785_s0, 0 }
 0x502   : > { %3307 = sbr.rel (%p3532_p4) target bundleno = 1306 (0x51a), region = 233  ;;  %s5999_s12 = smov (!%p3532_p4), %s5779_s11 }
 0x503   : > { %s6000_s17 = smov (!%p3532_p4), %s5320_s18  ;;  %s5794_s20 = smov (!%p3532_p4), 0  }
 0x504   : > { %s5796_s15 = smov (!%p3532_p4), 0  }
 0x509 LB: >> { %v3080_v6 = vld [vmem:[%s4303_s17] sm:$0xff]  ;;  %v3082_v7 = vld [vmem:[%s4303_s17 + $0x8] sm:$0xff]  ;;  %v3084_v36 = vld [vmem:[%s4303_s17 + $0x10] sm:$0xff]  ;;  %s3144_s25 = sadd.s32 1, %s4307_s20  ;;  %s3074_s15 = sadd.s32 1, %s4311_s15   ;;  %s4311_s15 = sphi %s5796_s15, %s3074_s15   ;;  %s4307_s20 = sphi %s5794_s20, %s6003_s20   ;;  %s4303_s17 = sphi %s6000_s17, %s6002_s17   ;;  %s4299_s12 = sphi %s5999_s12, %s6001_s12  }
 0x50a   : >> { %3081 = vst [vmem:[%s4299_s12] sm:$0xff] %v3080_v6  ;;  %3083 = vst [vmem:[%s4299_s12 + $0x8] sm:$0xff] %v3082_v7  ;;  %v3086_v43 = vld [vmem:[%s4303_s17 + $0x18] sm:$0xff]  ;;  %v3088_v5 = vld [vmem:[%s4303_s17 + $0x20] sm:$0xff]  ;;  %p3145_p5 = scmp.ge.s32.totalorder %s3144_s25, %s5785_s0  ;;  %p3073_p6 = scmp.ge.s32.totalorder %s3074_s15, %s5785_s0 }
 0x50b   : >> { %3085 = vst [vmem:[%s4299_s12 + $0x10] sm:$0xff] %v3084_v36  ;;  %v3090_v19 = vld [vmem:[%s4303_s17 + $0x28] sm:$0xff]  ;;  %3087 = vst [vmem:[%s4299_s12 + $0x18] sm:$0xff] %v3086_v43  ;;  %v3092_v59 = vld [vmem:[%s4303_s17 + $0x30] sm:$0xff] }
 0x50c   : >> { %3089 = vst [vmem:[%s4299_s12 + $0x20] sm:$0xff] %v3088_v5  ;;  %3091 = vst [vmem:[%s4299_s12 + $0x28] sm:$0xff] %v3090_v19  ;;  %v3094_v61 = vld [vmem:[%s4303_s17 + $0x38] sm:$0xff]  ;;  %v3096_v44 = vld [vmem:[%s4303_s17 + $0x40] sm:$0xff]  ;;  %s6016_s25 = smov (%p3145_p5, %s3144_s25), 0 }
 0x50d   : >> { %3093 = vst [vmem:[%s4299_s12 + $0x30] sm:$0xff] %v3092_v59  ;;  %3095 = vst [vmem:[%s4299_s12 + $0x38] sm:$0xff] %v3094_v61  ;;  %v3098_v23 = vld [vmem:[%s4303_s17 + $0x48] sm:$0xff]  ;;  %v3100_v41 = vld [vmem:[%s4303_s17 + $0x50] sm:$0xff]  ;;  %s3533_s27 = sshll.u32 %s6016_s25, 8  ;;  %s6003_s20 = smov %s6016_s25 }
 0x50e   : >> { %3097 = vst [vmem:[%s4299_s12 + $0x40] sm:$0xff] %v3096_v44  ;;  %v3102_v56 = vld [vmem:[%s4303_s17 + $0x58] sm:$0xff]  ;;  %3099 = vst [vmem:[%s4299_s12 + $0x48] sm:$0xff] %v3098_v23  ;;  %v3104_v48 = vld [vmem:[%s4303_s17 + $0x60] sm:$0xff]  ;;  %s5852_s19 = scalar_lea.vmem %s5320_s18, %s3533_s27 [#allocation3]   ;;  %s3150_s24 = scalar_lea.vmem %s5779_s11, %s3533_s27  }
 0x50f   : >> { %3101 = vst [vmem:[%s4299_s12 + $0x50] sm:$0xff] %v3100_v41  ;;  %3103 = vst [vmem:[%s4299_s12 + $0x58] sm:$0xff] %v3102_v56  ;;  %v3106_v24 = vld [vmem:[%s4303_s17 + $0x68] sm:$0xff]  ;;  %v3108_v2 = vld [vmem:[%s4303_s17 + $0x70] sm:$0xff] }
 0x510   : >> { %3105 = vst [vmem:[%s4299_s12 + $0x60] sm:$0xff] %v3104_v48  ;;  %3107 = vst [vmem:[%s4299_s12 + $0x68] sm:$0xff] %v3106_v24  ;;  %v3110_v26 = vld [vmem:[%s4303_s17 + $0x78] sm:$0xff]  ;;  %v3112_v39 = vld [vmem:[%s4303_s17 + $0x80] sm:$0xff] }
 0x511   : >> { %3109 = vst [vmem:[%s4299_s12 + $0x70] sm:$0xff] %v3108_v2  ;;  %v3114_v49 = vld [vmem:[%s4303_s17 + $0x88] sm:$0xff]  ;;  %3111 = vst [vmem:[%s4299_s12 + $0x78] sm:$0xff] %v3110_v26  ;;  %v3116_v1 = vld [vmem:[%s4303_s17 + $0x90] sm:$0xff] }
 0x512   : >> { %3113 = vst [vmem:[%s4299_s12 + $0x80] sm:$0xff] %v3112_v39  ;;  %3115 = vst [vmem:[%s4299_s12 + $0x88] sm:$0xff] %v3114_v49  ;;  %v3118_v29 = vld [vmem:[%s4303_s17 + $0x98] sm:$0xff]  ;;  %v3120_v9 = vld [vmem:[%s4303_s17 + $0xa0] sm:$0xff] }
 0x513   : >> { %3117 = vst [vmem:[%s4299_s12 + $0x90] sm:$0xff] %v3116_v1  ;;  %3119 = vst [vmem:[%s4299_s12 + $0x98] sm:$0xff] %v3118_v29  ;;  %v3122_v13 = vld [vmem:[%s4303_s17 + $0xa8] sm:$0xff]  ;;  %v3124_v50 = vld [vmem:[%s4303_s17 + $0xb0] sm:$0xff]  ;;  %3076 = sbr.rel (!%p3073_p6) target bundleno = 1289 (0x509), region = 239 }
 0x514   : >> { %3121 = vst [vmem:[%s4299_s12 + $0xa0] sm:$0xff] %v3120_v9  ;;  %v3126_v57 = vld [vmem:[%s4303_s17 + $0xb8] sm:$0xff]  ;;  %3123 = vst [vmem:[%s4299_s12 + $0xa8] sm:$0xff] %v3122_v13  ;;  %v3128_v0 = vld [vmem:[%s4303_s17 + $0xc0] sm:$0xff] }
 0x515   : >> { %3125 = vst [vmem:[%s4299_s12 + $0xb0] sm:$0xff] %v3124_v50  ;;  %3127 = vst [vmem:[%s4299_s12 + $0xb8] sm:$0xff] %v3126_v57  ;;  %v3130_v27 = vld [vmem:[%s4303_s17 + $0xc8] sm:$0xff]  ;;  %v3132_v3 = vld [vmem:[%s4303_s17 + $0xd0] sm:$0xff] }
 0x516   : >> { %3129 = vst [vmem:[%s4299_s12 + $0xc0] sm:$0xff] %v3128_v0  ;;  %3131 = vst [vmem:[%s4299_s12 + $0xc8] sm:$0xff] %v3130_v27  ;;  %v3134_v63 = vld [vmem:[%s4303_s17 + $0xd8] sm:$0xff]  ;;  %v3136_v20 = vld [vmem:[%s4303_s17 + $0xe0] sm:$0xff] }
 0x517   : >> { %3133 = vst [vmem:[%s4299_s12 + $0xd0] sm:$0xff] %v3132_v3  ;;  %v3138_v30 = vld [vmem:[%s4303_s17 + $0xe8] sm:$0xff]  ;;  %3135 = vst [vmem:[%s4299_s12 + $0xd8] sm:$0xff] %v3134_v63  ;;  %v3140_v22 = vld [vmem:[%s4303_s17 + $0xf0] sm:$0xff] }
 0x518   : >> { %3137 = vst [vmem:[%s4299_s12 + $0xe0] sm:$0xff] %v3136_v20  ;;  %3139 = vst [vmem:[%s4299_s12 + $0xe8] sm:$0xff] %v3138_v30  ;;  %v3142_v55 = vld [vmem:[%s4303_s17 + $0xf8] sm:$0xff]  ;;  %s6002_s17 = smov %s5852_s19 }
 0x519   : >> { %3141 = vst [vmem:[%s4299_s12 + $0xf0] sm:$0xff] %v3140_v22  ;;  %3143 = vst [vmem:[%s4299_s12 + $0xf8] sm:$0xff] %v3142_v55  ;;  %s6001_s12 = smov %s3150_s24 }
 0x51a PF: > { %s5893_s23 = sand.u32 31, %s6014_s1   ;;  %s3547_s30 = sshll.u32 %s5785_s0, 8 }
 0x51b   : > { %s3155_s22 = scalar_lea.vmem %s5320_s18, %s3547_s30 [#allocation3]   ;;  %s3157_s21 = scalar_lea.vmem %s5779_s11, %s3547_s30  }
 0x51c   : > { %p3538_p7 = scmp.le.s32.totalorder %s5893_s23, 0 }
 0x51d   : > { %s4313_s26 = smov (!%p3538_p7), %s3157_s21   ;;  %s4317_s28 = smov (!%p3538_p7), %s3155_s22  }
 0x51e   : > { %3321 = sbr.rel (%p3538_p7) target bundleno = 1327 (0x52f), region = 244  ;;  %s4321_s29 = smov (!%p3538_p7), 0  }
 0x51f   : > { %s4325_s14 = smov (!%p3538_p7), 0  }
 0x525 LB: >> { %v3167_v28 = vld [vmem:[%s4319_s28] sm:$0xff]  ;;  %s3169_s1 = sadd.s32 1, %s4323_s29  ;;  %s3161_s14 = sadd.s32 1, %s4327_s14   ;;  %s4327_s14 = sphi %s4325_s14, %s3161_s14   ;;  %s4323_s29 = sphi %s4321_s29, %s4322_s29   ;;  %s4319_s28 = sphi %s4317_s28, %s3174_s28   ;;  %s4315_s26 = sphi %s4313_s26, %s3175_s26  }
 0x526   : >> { %3168 = vst [vmem:[%s4315_s26] sm:$0xff] %v3167_v28  ;;  %p3170_p8 = scmp.ge.s32.totalorder %s3169_s1, %s5893_s23  ;;  %p3160_p9 = scmp.ge.s32.totalorder %s3161_s14, %s5893_s23 }
 0x528   : >> { %s6018_s1 = smov (%p3170_p8, %s3169_s1), 0  ;;  %3163 = sbr.rel (!%p3160_p9) target bundleno = 1317 (0x525), region = 250 }
 0x529   : >> { %s3539_s18 = sshll.u32 %s6018_s1, 3  ;;  %s4322_s29 = smov %s6018_s1  }
 0x52a   : >> { %s3174_s28 = scalar_lea.vmem %s3155_s22, %s3539_s18 [#allocation3]   ;;  %s3175_s26 = scalar_lea.vmem %s3157_s21, %s3539_s18  }
 0x52f PF: > { %p17_p10 = scmp.ge.s32.totalorder %s4398_s13, 4   ;;  %s6004_s30 = smov %s4259_s10 }
 0x530   : > { %s6005_s10 = smov %s4406_s16  ;;  %s6006_s11 = smov %s4398_s13 }
 0x531   :  { %19 = sbr.rel (!%p17_p10) target bundleno = 5 (0x5), region = 261 }

</bundles_post_ra>
